<compile_context>
chip_gen: v7x
topology: tpu7x:2x2x1
jax: 0.10.0
libtpu: 0.0.40
codegen_flags: <defaults>
</compile_context>

<pallas_src>
import functools
import math

import jax
import jax.numpy as jnp
from jax.experimental import pallas as pl
from jax.experimental.pallas import tpu as pltpu


# ----------------------------------------------------------------------------
# In-kernel helpers (pure jnp, f32 math)
# ----------------------------------------------------------------------------
def _layernorm(x, g, b, eps=1e-12):
    x = x.astype(jnp.float32)
    mean = jnp.mean(x, axis=-1, keepdims=True)
    var = jnp.mean(jnp.square(x - mean), axis=-1, keepdims=True)
    return (x - mean) * jax.lax.rsqrt(var + eps) * g + b


def _gelu(x):
    c = math.sqrt(2.0 / math.pi)
    return 0.5 * x * (1.0 + jnp.tanh(c * (x + 0.044715 * x * x * x)))


# ----------------------------------------------------------------------------
# Fused encoder-layer kernel.
# grid = (tower, layer); one grid step = one transformer layer of one tower.
# The activation x lives in a VMEM scratch carried across the layer axis.
# ----------------------------------------------------------------------------
def _encoder_layer_kernel(emb_ref, mask_ref, eg_ref, eb_ref,
                          wqkv_ref, bqkv_ref, wo_ref, bo_ref,
                          ln1g_ref, ln1b_ref, w1_ref, b1_ref, w2_ref, b2_ref,
                          ln2g_ref, ln2b_ref, o_ref, x_ref,
                          *, n_batch, n_heads, seq, head_dim):
    l = pl.program_id(1)
    n_layers = pl.num_programs(1)
    H = n_heads * head_dim
    M = n_batch * seq
    scale = 1.0 / math.sqrt(head_dim)

    # Layer 0: embedding LayerNorm into the carried activation scratch.
    @pl.when(l == 0)
    def _():
        x_ref[...] = _layernorm(emb_ref[0], eg_ref[0], eb_ref[0])

    x = x_ref[...]                                          # (M, H) f32

    # ---- self-attention: packed QKV projection (one [H, 3H] matmul) --------
    qkv = jnp.dot(x.astype(jnp.bfloat16), wqkv_ref[0, 0],
                  preferred_element_type=jnp.float32) + bqkv_ref[0, 0]

    # Hoist the mask broadcast out of the head loop (once per layer step).
    mask = jnp.broadcast_to(mask_ref[...], (n_batch, seq, seq))   # f32 additive

    ctx_heads = []
    for h in range(n_heads):
        c = h * head_dim
        q = qkv[:, c:c + head_dim].astype(jnp.bfloat16).reshape(
            n_batch, seq, head_dim)
        k = qkv[:, H + c:H + c + head_dim].astype(jnp.bfloat16).reshape(
            n_batch, seq, head_dim)
        v = qkv[:, 2 * H + c:2 * H + c + head_dim].astype(jnp.bfloat16).reshape(
            n_batch, seq, head_dim)
        # Batched QK^T over the batch dim (no explicit transpose).
        s = jnp.einsum('bqd,bkd->bqk', q, k,
                       preferred_element_type=jnp.float32)
        s = s * scale + mask
        s = s - jnp.max(s, axis=-1, keepdims=True)
        p = jnp.exp(s)
        p = p * pl.reciprocal(jnp.sum(p, axis=-1, keepdims=True), approx=True)
        ctx_h = jnp.einsum('bqk,bkd->bqd', p.astype(jnp.bfloat16), v,
                           preferred_element_type=jnp.float32)
        ctx_heads.append(ctx_h.reshape(M, head_dim))
    ctx = jnp.concatenate(ctx_heads, axis=-1)               # (M, H) lane-dense

    # Output projection + fused residual + LayerNorm.
    attn_out = jnp.dot(ctx.astype(jnp.bfloat16), wo_ref[0, 0],
                       preferred_element_type=jnp.float32) + bo_ref[0, 0]
    x = _layernorm(x + attn_out, ln1g_ref[0, 0], ln1b_ref[0, 0])

    # ---- feed-forward (bias + GELU fused, residual + LN fused) -------------
    h1 = jnp.dot(x.astype(jnp.bfloat16), w1_ref[0, 0],
                 preferred_element_type=jnp.float32) + b1_ref[0, 0]
    h1 = _gelu(h1)
    h2 = jnp.dot(h1.astype(jnp.bfloat16), w2_ref[0, 0],
                 preferred_element_type=jnp.float32) + b2_ref[0, 0]
    x = _layernorm(x + h2, ln2g_ref[0, 0], ln2b_ref[0, 0])

    x_ref[...] = x                                          # carry to next layer

    @pl.when(l == n_layers - 1)
    def _():
        o_ref[0] = x.astype(o_ref.dtype)


def pallas_dual_encoder(emb_flat, mask_add, tw, *, n_layers, n_heads,
                        n_batch, seq):
    T, M, H = emb_flat.shape                                # T = 2 towers, M = B*S
    head_dim = H // n_heads

    def tower_spec(a):          # per-tower, layer-invariant (emb, emb-LN params)
        nd = a.ndim
        return pl.BlockSpec((1,) + tuple(a.shape[1:]),
                            lambda t, l, _nd=nd: (t,) + (0,) * (_nd - 1))

    def layer_spec(a):          # per-tower, per-layer weight slab
        nd = a.ndim
        return pl.BlockSpec((1, 1) + tuple(a.shape[2:]),
                            lambda t, l, _nd=nd: (t, l) + (0,) * (_nd - 2))

    def shared_spec(a):         # shared across towers/layers (attention mask)
        nd = a.ndim
        return pl.BlockSpec(tuple(a.shape), lambda t, l, _nd=nd: (0,) * _nd)

    per_layer = [tw["wqkv"], tw["bqkv"], tw["wo"], tw["bo"],
                 tw["ln1_g"], tw["ln1_b"],
                 tw["w1"], tw["b1"], tw["w2"], tw["b2"],
                 tw["ln2_g"], tw["ln2_b"]]

    kernel = functools.partial(_encoder_layer_kernel, n_batch=n_batch,
                               n_heads=n_heads, seq=seq, head_dim=head_dim)

    return pl.pallas_call(
        kernel,
        grid=(T, n_layers),
        in_specs=[tower_spec(emb_flat), shared_spec(mask_add),
                  tower_spec(tw["emb_ln_g"]), tower_spec(tw["emb_ln_b"])]
                 + [layer_spec(a) for a in per_layer],
        out_specs=pl.BlockSpec((1, M, H), lambda t, l: (t, 0, 0)),
        out_shape=jax.ShapeDtypeStruct((T, M, H), jnp.bfloat16),
        scratch_shapes=[pltpu.VMEM((M, H), jnp.float32)],   # carried activation
        compiler_params=pltpu.CompilerParams(
            # tower axis independent ("parallel"); layer axis is a carried
            # chain -> "arbitrary".
            dimension_semantics=("parallel", "arbitrary")),
    )(emb_flat, mask_add, tw["emb_ln_g"], tw["emb_ln_b"], *per_layer)


# ----------------------------------------------------------------------------
# Classifier + BCE-with-logits loss: plain XLA (smaller than one vreg of work;
# a pallas_call launch here costs more than it saves).
# ----------------------------------------------------------------------------
def classifier_bce(pooled, w, b, labels):
    z = jnp.dot(pooled, w, preferred_element_type=jnp.float32) + b
    y = labels.astype(jnp.float32)
    per = jnp.maximum(z, 0.0) - z * y + jnp.log1p(jnp.exp(-jnp.abs(z)))
    return jnp.mean(per), z


# ----------------------------------------------------------------------------
# Full BertCombined forward (glue in plain JAX)
# ----------------------------------------------------------------------------
def bert_combined_forward(params, input_ids, attention_mask, mention_pos_idx,
                          labels, n_heads=2, comb_opn="concat"):
    tw = params["towers"]
    B, S = input_ids.shape
    H = tw["word_emb"].shape[-1]
    n_layers = tw["wqkv"].shape[1]

    # Embeddings (gather stays in XLA; token_type_ids assumed all zeros).
    emb = (tw["word_emb"][:, input_ids, :]
           + tw["pos_emb"][:, None, :S, :]
           + tw["type_emb"][:, 0][:, None, None, :])        # [2, B, S, H] f32
    emb_flat = emb.reshape(2, B * S, H).astype(jnp.bfloat16)

    # Additive mask, precomputed once, shaped (B, 1, S) for in-kernel broadcast.
    mask_add = ((1.0 - attention_mask.astype(jnp.float32))
                * -10000.0).reshape(B, 1, S)

    seq_out = pallas_dual_encoder(emb_flat, mask_add, tw,
                                  n_layers=n_layers, n_heads=n_heads,
                                  n_batch=B, seq=S)          # [2, B*S, H] bf16

    men_idx = jnp.arange(B) * S + mention_pos_idx
    wiki_embed = seq_out[0][men_idx].astype(jnp.float32)     # [B, H]
    pubmed_embed = seq_out[1][men_idx].astype(jnp.float32)   # [B, H]

    if comb_opn == "concat":
        pooled = jnp.concatenate([wiki_embed, pubmed_embed], axis=1)
    elif comb_opn == "add":
        pooled = wiki_embed + pubmed_embed
    else:
        raise NotImplementedError

    # dropout: eval-mode identity (see TODO at top of file)
    loss, logits = classifier_bce(pooled, params["cls_w"], params["cls_b"],
                                  labels)
    return loss, logits


# ----------------------------------------------------------------------------
# Deterministic parameter synthesis (weights stacked per-layer, per-tower)
# ----------------------------------------------------------------------------
def init_tower_params(key, vocab, max_pos, hidden, inter, n_layers):
    ks = jax.random.split(key, 3 + n_layers)

    def nrm(k, shape):
        return 0.02 * jax.random.normal(k, shape, jnp.float32)

    acc = {k: [] for k in ["wqkv", "bqkv", "wo", "bo", "ln1_g", "ln1_b",
                           "w1", "b1", "w2", "b2", "ln2_g", "ln2_b"]}
    for i in range(n_layers):
        lks = jax.random.split(ks[3 + i], 6)
        qw = nrm(lks[0], (hidden, hidden))
        kw = nrm(lks[1], (hidden, hidden))
        vw = nrm(lks[2], (hidden, hidden))
        acc["wqkv"].append(jnp.concatenate([qw, kw, vw], axis=1).astype(jnp.bfloat16))
        acc["bqkv"].append(jnp.zeros((1, 3 * hidden), jnp.float32))
        acc["wo"].append(nrm(lks[3], (hidden, hidden)).astype(jnp.bfloat16))
        acc["bo"].append(jnp.zeros((1, hidden), jnp.float32))
        acc["ln1_g"].append(jnp.ones((1, hidden), jnp.float32))
        acc["ln1_b"].append(jnp.zeros((1, hidden), jnp.float32))
        acc["w1"].append(nrm(lks[4], (hidden, inter)).astype(jnp.bfloat16))
        acc["b1"].append(jnp.zeros((1, inter), jnp.float32))
        acc["w2"].append(nrm(lks[5], (inter, hidden)).astype(jnp.bfloat16))
        acc["b2"].append(jnp.zeros((1, hidden), jnp.float32))
        acc["ln2_g"].append(jnp.ones((1, hidden), jnp.float32))
        acc["ln2_b"].append(jnp.zeros((1, hidden), jnp.float32))

    tower = {k: jnp.stack(v, axis=0) for k, v in acc.items()}   # leading layer dim
    tower.update({
        "word_emb": nrm(ks[0], (vocab, hidden)),
        "pos_emb": nrm(ks[1], (max_pos, hidden)),
        "type_emb": nrm(ks[2], (2, hidden)),
        "emb_ln_g": jnp.ones((1, hidden), jnp.float32),
        "emb_ln_b": jnp.zeros((1, hidden), jnp.float32),
    })
    return tower


# ----------------------------------------------------------------------------
# Main
# ----------------------------------------------------------------------------
if __name__ == "__main__":
    B, S, H, NH, INTER = 2, 8, 32, 2, 64
    VOCAB, MAX_POS, N_LAYERS, NUM_LABELS = 64, 16, 2, 4

    key = jax.random.PRNGKey(0)
    k_wiki, k_pub, k_cls, k_ids, k_lab = jax.random.split(key, 5)

    wiki = init_tower_params(k_wiki, VOCAB, MAX_POS, H, INTER, N_LAYERS)
    pubmed = init_tower_params(k_pub, VOCAB, MAX_POS, H, INTER, N_LAYERS)
    towers = jax.tree_util.tree_map(lambda a, b: jnp.stack([a, b], axis=0),
                                    wiki, pubmed)

    params = {
        "towers": towers,
        # comb_opn == "concat" -> class_in = 2 * hidden
        "cls_w": 0.02 * jax.random.normal(k_cls, (2 * H, NUM_LABELS), jnp.float32),
        "cls_b": jnp.zeros((NUM_LABELS,), jnp.float32),
    }

    input_ids = jax.random.randint(k_ids, (B, S), 0, VOCAB, dtype=jnp.int32)
    attention_mask = jnp.array([[1, 1, 1, 1, 1, 1, 1, 1],
                                [1, 1, 1, 1, 1, 1, 0, 0]], jnp.int32)
    mention_pos_idx = jnp.array([1, 3], jnp.int32)
    labels = (jax.random.uniform(k_lab, (B, NUM_LABELS)) > 0.5).astype(jnp.float32)

    fwd = jax.jit(functools.partial(bert_combined_forward,
                                    n_heads=NH, comb_opn="concat"))
    loss, logits = fwd(params, input_ids, attention_mask, mention_pos_idx, labels)
    jax.block_until_ready((loss, logits))

    assert logits.shape == (B, NUM_LABELS)
    assert loss.shape == ()
    print("KERNEL_OK")
</pallas_src>

<mosaic_0001>
module attributes {stable_mosaic.version = 11 : i64} {
  func.func @_encoder_layer_kernel(%arg0: i32, %arg1: i32, %arg2: memref<1x16x32xbf16, #tpu.memory_space<vmem>>, %arg3: memref<2x1x8xf32, #tpu.memory_space<vmem>>, %arg4: memref<1x1x32xf32, #tpu.memory_space<vmem>>, %arg5: memref<1x1x32xf32, #tpu.memory_space<vmem>>, %arg6: memref<1x1x32x96xbf16, #tpu.memory_space<vmem>>, %arg7: memref<1x1x1x96xf32, #tpu.memory_space<vmem>>, %arg8: memref<1x1x32x32xbf16, #tpu.memory_space<vmem>>, %arg9: memref<1x1x1x32xf32, #tpu.memory_space<vmem>>, %arg10: memref<1x1x1x32xf32, #tpu.memory_space<vmem>>, %arg11: memref<1x1x1x32xf32, #tpu.memory_space<vmem>>, %arg12: memref<1x1x32x64xbf16, #tpu.memory_space<vmem>>, %arg13: memref<1x1x1x64xf32, #tpu.memory_space<vmem>>, %arg14: memref<1x1x64x32xbf16, #tpu.memory_space<vmem>>, %arg15: memref<1x1x1x32xf32, #tpu.memory_space<vmem>>, %arg16: memref<1x1x1x32xf32, #tpu.memory_space<vmem>>, %arg17: memref<1x1x1x32xf32, #tpu.memory_space<vmem>>, %arg18: memref<1x16x32xbf16, #tpu.memory_space<vmem>>, %arg19: memref<16x32xf32, #tpu.memory_space<vmem>>) attributes {dimension_semantics = [#tpu.dimension_semantics<parallel>, #tpu.dimension_semantics<arbitrary>], iteration_bounds = array<i64: 2, 2>, scalar_prefetch = 0 : i64, scratch_operands = 1 : i64, tpu.core_type = #tpu.core_type<tc>, window_params = [{transform_indices = @transform_0, window_bounds = array<i64: 1, 16, 32>}, {pipeline_mode = #tpu.pipeline_mode<synchronous>, transform_indices = @transform_1, window_bounds = array<i64: 2, 1, 8>}, {transform_indices = @transform_2, window_bounds = array<i64: 1, 1, 32>}, {transform_indices = @transform_3, window_bounds = array<i64: 1, 1, 32>}, {transform_indices = @transform_4, window_bounds = array<i64: 1, 1, 32, 96>}, {transform_indices = @transform_5, window_bounds = array<i64: 1, 1, 1, 96>}, {transform_indices = @transform_6, window_bounds = array<i64: 1, 1, 32, 32>}, {transform_indices = @transform_7, window_bounds = array<i64: 1, 1, 1, 32>}, {transform_indices = @transform_8, window_bounds = array<i64: 1, 1, 1, 32>}, {transform_indices = @transform_9, window_bounds = array<i64: 1, 1, 1, 32>}, {transform_indices = @transform_10, window_bounds = array<i64: 1, 1, 32, 64>}, {transform_indices = @transform_11, window_bounds = array<i64: 1, 1, 1, 64>}, {transform_indices = @transform_12, window_bounds = array<i64: 1, 1, 64, 32>}, {transform_indices = @transform_13, window_bounds = array<i64: 1, 1, 1, 32>}, {transform_indices = @transform_14, window_bounds = array<i64: 1, 1, 1, 32>}, {transform_indices = @transform_15, window_bounds = array<i64: 1, 1, 1, 32>}, {transform_indices = @transform_16, window_bounds = array<i64: 1, 16, 32>}]} {
    %c0_i32 = arith.constant 0 : i32
    %0 = arith.cmpi eq, %arg1, %c0_i32 : i32
    %1 = arith.extui %0 : i1 to i32
    %c0_i32_0 = arith.constant 0 : i32
    %2 = arith.cmpi ne, %1, %c0_i32_0 : i32
    scf.if %2 {
      %c0_83 = arith.constant 0 : index
      %c0_84 = arith.constant 0 : index
      %c0_85 = arith.constant 0 : index
      %163 = vector.load %arg2[%c0_83, %c0_84, %c0_85] : memref<1x16x32xbf16, #tpu.memory_space<vmem>>, vector<1x16x32xbf16>
      %164 = vector.shape_cast %163 : vector<1x16x32xbf16> to vector<16x32xbf16>
      %c0_86 = arith.constant 0 : index
      %c0_87 = arith.constant 0 : index
      %c0_88 = arith.constant 0 : index
      %165 = vector.load %arg4[%c0_86, %c0_87, %c0_88] : memref<1x1x32xf32, #tpu.memory_space<vmem>>, vector<1x1x32xf32>
      %166 = vector.shape_cast %165 : vector<1x1x32xf32> to vector<1x32xf32>
      %c0_89 = arith.constant 0 : index
      %c0_90 = arith.constant 0 : index
      %c0_91 = arith.constant 0 : index
      %167 = vector.load %arg5[%c0_89, %c0_90, %c0_91] : memref<1x1x32xf32, #tpu.memory_space<vmem>>, vector<1x1x32xf32>
      %168 = vector.shape_cast %167 : vector<1x1x32xf32> to vector<1x32xf32>
      %169 = arith.extf %164 : vector<16x32xbf16> to vector<16x32xf32>
      %cst_92 = arith.constant dense<0.000000e+00> : vector<16xf32>
      %170 = vector.multi_reduction <add>, %169, %cst_92 [1] : vector<16x32xf32> to vector<16xf32>
      %171 = vector.shape_cast %170 : vector<16xf32> to vector<16x1xf32>
      %cst_93 = arith.constant 3.200000e+01 : f32
      %172 = vector.broadcast %cst_93 : f32 to vector<16x1xf32>
      %173 = arith.divf %171, %172 : vector<16x1xf32>
      %174 = vector.broadcast %173 : vector<16x1xf32> to vector<16x32xf32>
      %175 = arith.subf %169, %174 : vector<16x32xf32>
      %176 = arith.mulf %175, %175 : vector<16x32xf32>
      %cst_94 = arith.constant dense<0.000000e+00> : vector<16xf32>
      %177 = vector.multi_reduction <add>, %176, %cst_94 [1] : vector<16x32xf32> to vector<16xf32>
      %178 = vector.shape_cast %177 : vector<16xf32> to vector<16x1xf32>
      %cst_95 = arith.constant 3.200000e+01 : f32
      %179 = vector.broadcast %cst_95 : f32 to vector<16x1xf32>
      %180 = arith.divf %178, %179 : vector<16x1xf32>
      %181 = vector.broadcast %173 : vector<16x1xf32> to vector<16x32xf32>
      %182 = arith.subf %169, %181 : vector<16x32xf32>
      %cst_96 = arith.constant 9.99999996E-13 : f32
      %183 = vector.broadcast %cst_96 : f32 to vector<16x1xf32>
      %184 = arith.addf %180, %183 : vector<16x1xf32>
      %185 = math.rsqrt %184 : vector<16x1xf32>
      %186 = vector.broadcast %185 : vector<16x1xf32> to vector<16x32xf32>
      %187 = arith.mulf %182, %186 : vector<16x32xf32>
      %188 = vector.broadcast %166 : vector<1x32xf32> to vector<16x32xf32>
      %189 = arith.mulf %187, %188 : vector<16x32xf32>
      %190 = vector.broadcast %168 : vector<1x32xf32> to vector<16x32xf32>
      %191 = arith.addf %189, %190 : vector<16x32xf32>
      %c0_97 = arith.constant 0 : index
      %c0_98 = arith.constant 0 : index
      %192 = vector.load %arg19[%c0_97, %c0_98] : memref<16x32xf32, #tpu.memory_space<vmem>>, vector<16x32xf32>
      tpu.vector_store %arg19[%c0_97, %c0_98], %191 {strides = array<i32>} : memref<16x32xf32, #tpu.memory_space<vmem>>, vector<16x32xf32>,
    } else {
    }
    %c0 = arith.constant 0 : index
    %c0_1 = arith.constant 0 : index
    %3 = vector.load %arg19[%c0, %c0_1] : memref<16x32xf32, #tpu.memory_space<vmem>>, vector<16x32xf32>
    %4 = arith.truncf %3 : vector<16x32xf32> to vector<16x32xbf16>
    %c0_2 = arith.constant 0 : index
    %c0_3 = arith.constant 0 : index
    %c0_4 = arith.constant 0 : index
    %c0_5 = arith.constant 0 : index
    %5 = vector.load %arg6[%c0_2, %c0_3, %c0_4, %c0_5] : memref<1x1x32x96xbf16, #tpu.memory_space<vmem>>, vector<1x1x32x96xbf16>
    %6 = vector.shape_cast %5 : vector<1x1x32x96xbf16> to vector<32x96xbf16>
    %cst = arith.constant dense<0.000000e+00> : vector<16x96xf32>
    %7 = tpu.matmul %4, %6, %cst {dimension_numbers = #tpu.dot_dimension_numbers<[1], [0], [0], [1], [0, 0, 1, 1], [], []>} : vector<16x32xbf16>, vector<32x96xbf16>, vector<16x96xf32> -> vector<16x96xf32>
    %c0_6 = arith.constant 0 : index
    %c0_7 = arith.constant 0 : index
    %c0_8 = arith.constant 0 : index
    %c0_9 = arith.constant 0 : index
    %8 = vector.load %arg7[%c0_6, %c0_7, %c0_8, %c0_9] : memref<1x1x1x96xf32, #tpu.memory_space<vmem>>, vector<1x1x1x96xf32>
    %9 = vector.shape_cast %8 : vector<1x1x1x96xf32> to vector<1x96xf32>
    %10 = vector.broadcast %9 : vector<1x96xf32> to vector<16x96xf32>
    %11 = arith.addf %7, %10 : vector<16x96xf32>
    %c0_10 = arith.constant 0 : index
    %c0_11 = arith.constant 0 : index
    %c0_12 = arith.constant 0 : index
    %12 = vector.load %arg3[%c0_10, %c0_11, %c0_12] : memref<2x1x8xf32, #tpu.memory_space<vmem>>, vector<2x1x8xf32>
    %13 = vector.shape_cast %12 : vector<2x1x8xf32> to vector<2x1x8xf32>
    %14 = vector.broadcast %13 : vector<2x1x8xf32> to vector<2x8x8xf32>
    %15 = vector.extract_strided_slice %11 {offsets = [0, 0], sizes = [16, 16], strides = [1, 1]} : vector<16x96xf32> to vector<16x16xf32>
    %16 = arith.truncf %15 : vector<16x16xf32> to vector<16x16xbf16>
    %17 = vector.shape_cast %16 : vector<16x16xbf16> to vector<2x8x16xbf16>
    %18 = vector.extract_strided_slice %11 {offsets = [0, 32], sizes = [16, 16], strides = [1, 1]} : vector<16x96xf32> to vector<16x16xf32>
    %19 = arith.truncf %18 : vector<16x16xf32> to vector<16x16xbf16>
    %20 = vector.shape_cast %19 : vector<16x16xbf16> to vector<2x8x16xbf16>
    %21 = vector.extract_strided_slice %11 {offsets = [0, 64], sizes = [16, 16], strides = [1, 1]} : vector<16x96xf32> to vector<16x16xf32>
    %22 = arith.truncf %21 : vector<16x16xf32> to vector<16x16xbf16>
    %23 = vector.shape_cast %22 : vector<16x16xbf16> to vector<2x8x16xbf16>
    "tpu.trace_start"() <{level = 10 : i32, message = "bqd,bkd->bqk"}> : () -> ()
    %cst_13 = arith.constant dense<0.000000e+00> : vector<2x8x8xf32>
    %24 = tpu.matmul %17, %20, %cst_13 {dimension_numbers = #tpu.dot_dimension_numbers<[2], [2], [1], [1], [0, 0, 0, 1, 1, 1], [0], [0]>} : vector<2x8x16xbf16>, vector<2x8x16xbf16>, vector<2x8x8xf32> -> vector<2x8x8xf32>
    "tpu.trace_stop"() : () -> ()
    %cst_14 = arith.constant 2.500000e-01 : f32
    %25 = vector.broadcast %cst_14 : f32 to vector<2x8x8xf32>
    %26 = arith.mulf %24, %25 : vector<2x8x8xf32>
    %27 = arith.addf %26, %14 : vector<2x8x8xf32>
    %cst_15 = arith.constant dense<0xFF800000> : vector<2x8xf32>
    %28 = vector.multi_reduction <maximumf>, %27, %cst_15 [2] : vector<2x8x8xf32> to vector<2x8xf32>
    %29 = vector.shape_cast %28 : vector<2x8xf32> to vector<2x8x1xf32>
    %30 = vector.broadcast %29 : vector<2x8x1xf32> to vector<2x8x8xf32>
    %31 = arith.subf %27, %30 : vector<2x8x8xf32>
    %32 = math.exp %31 : vector<2x8x8xf32>
    %cst_16 = arith.constant dense<0.000000e+00> : vector<2x8xf32>
    %33 = vector.multi_reduction <add>, %32, %cst_16 [2] : vector<2x8x8xf32> to vector<2x8xf32>
    %34 = vector.shape_cast %33 : vector<2x8xf32> to vector<2x8x1xf32>
    %35 = tpu.reciprocal %34 {approx = true} : vector<2x8x1xf32> -> vector<2x8x1xf32>
    %36 = vector.broadcast %35 : vector<2x8x1xf32> to vector<2x8x8xf32>
    %37 = arith.mulf %32, %36 : vector<2x8x8xf32>
    %38 = arith.truncf %37 : vector<2x8x8xf32> to vector<2x8x8xbf16>
    "tpu.trace_start"() <{level = 10 : i32, message = "bqk,bkd->bqd"}> : () -> ()
    %cst_17 = arith.constant dense<0.000000e+00> : vector<2x8x16xf32>
    %39 = tpu.matmul %38, %23, %cst_17 {dimension_numbers = #tpu.dot_dimension_numbers<[2], [1], [1], [2], [0, 0, 0, 1, 1, 2], [0], [0]>} : vector<2x8x8xbf16>, vector<2x8x16xbf16>, vector<2x8x16xf32> -> vector<2x8x16xf32>
    "tpu.trace_stop"() : () -> ()
    %40 = vector.shape_cast %39 : vector<2x8x16xf32> to vector<16x16xf32>
    %41 = vector.extract_strided_slice %11 {offsets = [0, 16], sizes = [16, 16], strides = [1, 1]} : vector<16x96xf32> to vector<16x16xf32>
    %42 = arith.truncf %41 : vector<16x16xf32> to vector<16x16xbf16>
    %43 = vector.shape_cast %42 : vector<16x16xbf16> to vector<2x8x16xbf16>
    %44 = vector.extract_strided_slice %11 {offsets = [0, 48], sizes = [16, 16], strides = [1, 1]} : vector<16x96xf32> to vector<16x16xf32>
    %45 = arith.truncf %44 : vector<16x16xf32> to vector<16x16xbf16>
    %46 = vector.shape_cast %45 : vector<16x16xbf16> to vector<2x8x16xbf16>
    %47 = vector.extract_strided_slice %11 {offsets = [0, 80], sizes = [16, 16], strides = [1, 1]} : vector<16x96xf32> to vector<16x16xf32>
    %48 = arith.truncf %47 : vector<16x16xf32> to vector<16x16xbf16>
    %49 = vector.shape_cast %48 : vector<16x16xbf16> to vector<2x8x16xbf16>
    "tpu.trace_start"() <{level = 10 : i32, message = "bqd,bkd->bqk"}> : () -> ()
    %cst_18 = arith.constant dense<0.000000e+00> : vector<2x8x8xf32>
    %50 = tpu.matmul %43, %46, %cst_18 {dimension_numbers = #tpu.dot_dimension_numbers<[2], [2], [1], [1], [0, 0, 0, 1, 1, 1], [0], [0]>} : vector<2x8x16xbf16>, vector<2x8x16xbf16>, vector<2x8x8xf32> -> vector<2x8x8xf32>
    "tpu.trace_stop"() : () -> ()
    %cst_19 = arith.constant 2.500000e-01 : f32
    %51 = vector.broadcast %cst_19 : f32 to vector<2x8x8xf32>
    %52 = arith.mulf %50, %51 : vector<2x8x8xf32>
    %53 = arith.addf %52, %14 : vector<2x8x8xf32>
    %cst_20 = arith.constant dense<0xFF800000> : vector<2x8xf32>
    %54 = vector.multi_reduction <maximumf>, %53, %cst_20 [2] : vector<2x8x8xf32> to vector<2x8xf32>
    %55 = vector.shape_cast %54 : vector<2x8xf32> to vector<2x8x1xf32>
    %56 = vector.broadcast %55 : vector<2x8x1xf32> to vector<2x8x8xf32>
    %57 = arith.subf %53, %56 : vector<2x8x8xf32>
    %58 = math.exp %57 : vector<2x8x8xf32>
    %cst_21 = arith.constant dense<0.000000e+00> : vector<2x8xf32>
    %59 = vector.multi_reduction <add>, %58, %cst_21 [2] : vector<2x8x8xf32> to vector<2x8xf32>
    %60 = vector.shape_cast %59 : vector<2x8xf32> to vector<2x8x1xf32>
    %61 = tpu.reciprocal %60 {approx = true} : vector<2x8x1xf32> -> vector<2x8x1xf32>
    %62 = vector.broadcast %61 : vector<2x8x1xf32> to vector<2x8x8xf32>
    %63 = arith.mulf %58, %62 : vector<2x8x8xf32>
    %64 = arith.truncf %63 : vector<2x8x8xf32> to vector<2x8x8xbf16>
    "tpu.trace_start"() <{level = 10 : i32, message = "bqk,bkd->bqd"}> : () -> ()
    %cst_22 = arith.constant dense<0.000000e+00> : vector<2x8x16xf32>
    %65 = tpu.matmul %64, %49, %cst_22 {dimension_numbers = #tpu.dot_dimension_numbers<[2], [1], [1], [2], [0, 0, 0, 1, 1, 2], [0], [0]>} : vector<2x8x8xbf16>, vector<2x8x16xbf16>, vector<2x8x16xf32> -> vector<2x8x16xf32>
    "tpu.trace_stop"() : () -> ()
    %66 = vector.shape_cast %65 : vector<2x8x16xf32> to vector<16x16xf32>
    %67 = tpu.concatenate %40, %66 in 1 : vector<16x16xf32>, vector<16x16xf32> -> vector<16x32xf32>
    %68 = arith.truncf %67 : vector<16x32xf32> to vector<16x32xbf16>
    %c0_23 = arith.constant 0 : index
    %c0_24 = arith.constant 0 : index
    %c0_25 = arith.constant 0 : index
    %c0_26 = arith.constant 0 : index
    %69 = vector.load %arg8[%c0_23, %c0_24, %c0_25, %c0_26] : memref<1x1x32x32xbf16, #tpu.memory_space<vmem>>, vector<1x1x32x32xbf16>
    %70 = vector.shape_cast %69 : vector<1x1x32x32xbf16> to vector<32x32xbf16>
    %cst_27 = arith.constant dense<0.000000e+00> : vector<16x32xf32>
    %71 = tpu.matmul %68, %70, %cst_27 {dimension_numbers = #tpu.dot_dimension_numbers<[1], [0], [0], [1], [0, 0, 1, 1], [], []>} : vector<16x32xbf16>, vector<32x32xbf16>, vector<16x32xf32> -> vector<16x32xf32>
    %c0_28 = arith.constant 0 : index
    %c0_29 = arith.constant 0 : index
    %c0_30 = arith.constant 0 : index
    %c0_31 = arith.constant 0 : index
    %72 = vector.load %arg9[%c0_28, %c0_29, %c0_30, %c0_31] : memref<1x1x1x32xf32, #tpu.memory_space<vmem>>, vector<1x1x1x32xf32>
    %73 = vector.shape_cast %72 : vector<1x1x1x32xf32> to vector<1x32xf32>
    %74 = vector.broadcast %73 : vector<1x32xf32> to vector<16x32xf32>
    %75 = arith.addf %71, %74 : vector<16x32xf32>
    %76 = arith.addf %3, %75 : vector<16x32xf32>
    %c0_32 = arith.constant 0 : index
    %c0_33 = arith.constant 0 : index
    %c0_34 = arith.constant 0 : index
    %c0_35 = arith.constant 0 : index
    %77 = vector.load %arg10[%c0_32, %c0_33, %c0_34, %c0_35] : memref<1x1x1x32xf32, #tpu.memory_space<vmem>>, vector<1x1x1x32xf32>
    %78 = vector.shape_cast %77 : vector<1x1x1x32xf32> to vector<1x32xf32>
    %c0_36 = arith.constant 0 : index
    %c0_37 = arith.constant 0 : index
    %c0_38 = arith.constant 0 : index
    %c0_39 = arith.constant 0 : index
    %79 = vector.load %arg11[%c0_36, %c0_37, %c0_38, %c0_39] : memref<1x1x1x32xf32, #tpu.memory_space<vmem>>, vector<1x1x1x32xf32>
    %80 = vector.shape_cast %79 : vector<1x1x1x32xf32> to vector<1x32xf32>
    %cst_40 = arith.constant dense<0.000000e+00> : vector<16xf32>
    %81 = vector.multi_reduction <add>, %76, %cst_40 [1] : vector<16x32xf32> to vector<16xf32>
    %82 = vector.shape_cast %81 : vector<16xf32> to vector<16x1xf32>
    %cst_41 = arith.constant 3.200000e+01 : f32
    %83 = vector.broadcast %cst_41 : f32 to vector<16x1xf32>
    %84 = arith.divf %82, %83 : vector<16x1xf32>
    %85 = vector.broadcast %84 : vector<16x1xf32> to vector<16x32xf32>
    %86 = arith.subf %76, %85 : vector<16x32xf32>
    %87 = arith.mulf %86, %86 : vector<16x32xf32>
    %cst_42 = arith.constant dense<0.000000e+00> : vector<16xf32>
    %88 = vector.multi_reduction <add>, %87, %cst_42 [1] : vector<16x32xf32> to vector<16xf32>
    %89 = vector.shape_cast %88 : vector<16xf32> to vector<16x1xf32>
    %cst_43 = arith.constant 3.200000e+01 : f32
    %90 = vector.broadcast %cst_43 : f32 to vector<16x1xf32>
    %91 = arith.divf %89, %90 : vector<16x1xf32>
    %92 = vector.broadcast %84 : vector<16x1xf32> to vector<16x32xf32>
    %93 = arith.subf %76, %92 : vector<16x32xf32>
    %cst_44 = arith.constant 9.99999996E-13 : f32
    %94 = vector.broadcast %cst_44 : f32 to vector<16x1xf32>
    %95 = arith.addf %91, %94 : vector<16x1xf32>
    %96 = math.rsqrt %95 : vector<16x1xf32>
    %97 = vector.broadcast %96 : vector<16x1xf32> to vector<16x32xf32>
    %98 = arith.mulf %93, %97 : vector<16x32xf32>
    %99 = vector.broadcast %78 : vector<1x32xf32> to vector<16x32xf32>
    %100 = arith.mulf %98, %99 : vector<16x32xf32>
    %101 = vector.broadcast %80 : vector<1x32xf32> to vector<16x32xf32>
    %102 = arith.addf %100, %101 : vector<16x32xf32>
    %103 = arith.truncf %102 : vector<16x32xf32> to vector<16x32xbf16>
    %c0_45 = arith.constant 0 : index
    %c0_46 = arith.constant 0 : index
    %c0_47 = arith.constant 0 : index
    %c0_48 = arith.constant 0 : index
    %104 = vector.load %arg12[%c0_45, %c0_46, %c0_47, %c0_48] : memref<1x1x32x64xbf16, #tpu.memory_space<vmem>>, vector<1x1x32x64xbf16>
    %105 = vector.shape_cast %104 : vector<1x1x32x64xbf16> to vector<32x64xbf16>
    %cst_49 = arith.constant dense<0.000000e+00> : vector<16x64xf32>
    %106 = tpu.matmul %103, %105, %cst_49 {dimension_numbers = #tpu.dot_dimension_numbers<[1], [0], [0], [1], [0, 0, 1, 1], [], []>} : vector<16x32xbf16>, vector<32x64xbf16>, vector<16x64xf32> -> vector<16x64xf32>
    %c0_50 = arith.constant 0 : index
    %c0_51 = arith.constant 0 : index
    %c0_52 = arith.constant 0 : index
    %c0_53 = arith.constant 0 : index
    %107 = vector.load %arg13[%c0_50, %c0_51, %c0_52, %c0_53] : memref<1x1x1x64xf32, #tpu.memory_space<vmem>>, vector<1x1x1x64xf32>
    %108 = vector.shape_cast %107 : vector<1x1x1x64xf32> to vector<1x64xf32>
    %109 = vector.broadcast %108 : vector<1x64xf32> to vector<16x64xf32>
    %110 = arith.addf %106, %109 : vector<16x64xf32>
    %cst_54 = arith.constant 5.000000e-01 : f32
    %111 = vector.broadcast %cst_54 : f32 to vector<16x64xf32>
    %112 = arith.mulf %111, %110 : vector<16x64xf32>
    %cst_55 = arith.constant 4.471500e-02 : f32
    %113 = vector.broadcast %cst_55 : f32 to vector<16x64xf32>
    %114 = arith.mulf %113, %110 : vector<16x64xf32>
    %115 = arith.mulf %114, %110 : vector<16x64xf32>
    %116 = arith.mulf %115, %110 : vector<16x64xf32>
    %117 = arith.addf %110, %116 : vector<16x64xf32>
    %cst_56 = arith.constant 0.797884583 : f32
    %118 = vector.broadcast %cst_56 : f32 to vector<16x64xf32>
    %119 = arith.mulf %118, %117 : vector<16x64xf32>
    %120 = math.tanh %119 : vector<16x64xf32>
    %cst_57 = arith.constant 1.000000e+00 : f32
    %121 = vector.broadcast %cst_57 : f32 to vector<16x64xf32>
    %122 = arith.addf %121, %120 : vector<16x64xf32>
    %123 = arith.mulf %112, %122 : vector<16x64xf32>
    %124 = arith.truncf %123 : vector<16x64xf32> to vector<16x64xbf16>
    %c0_58 = arith.constant 0 : index
    %c0_59 = arith.constant 0 : index
    %c0_60 = arith.constant 0 : index
    %c0_61 = arith.constant 0 : index
    %125 = vector.load %arg14[%c0_58, %c0_59, %c0_60, %c0_61] : memref<1x1x64x32xbf16, #tpu.memory_space<vmem>>, vector<1x1x64x32xbf16>
    %126 = vector.shape_cast %125 : vector<1x1x64x32xbf16> to vector<64x32xbf16>
    %cst_62 = arith.constant dense<0.000000e+00> : vector<16x32xf32>
    %127 = tpu.matmul %124, %126, %cst_62 {dimension_numbers = #tpu.dot_dimension_numbers<[1], [0], [0], [1], [0, 0, 1, 1], [], []>} : vector<16x64xbf16>, vector<64x32xbf16>, vector<16x32xf32> -> vector<16x32xf32>
    %c0_63 = arith.constant 0 : index
    %c0_64 = arith.constant 0 : index
    %c0_65 = arith.constant 0 : index
    %c0_66 = arith.constant 0 : index
    %128 = vector.load %arg15[%c0_63, %c0_64, %c0_65, %c0_66] : memref<1x1x1x32xf32, #tpu.memory_space<vmem>>, vector<1x1x1x32xf32>
    %129 = vector.shape_cast %128 : vector<1x1x1x32xf32> to vector<1x32xf32>
    %130 = vector.broadcast %129 : vector<1x32xf32> to vector<16x32xf32>
    %131 = arith.addf %127, %130 : vector<16x32xf32>
    %132 = arith.addf %102, %131 : vector<16x32xf32>
    %c0_67 = arith.constant 0 : index
    %c0_68 = arith.constant 0 : index
    %c0_69 = arith.constant 0 : index
    %c0_70 = arith.constant 0 : index
    %133 = vector.load %arg16[%c0_67, %c0_68, %c0_69, %c0_70] : memref<1x1x1x32xf32, #tpu.memory_space<vmem>>, vector<1x1x1x32xf32>
    %134 = vector.shape_cast %133 : vector<1x1x1x32xf32> to vector<1x32xf32>
    %c0_71 = arith.constant 0 : index
    %c0_72 = arith.constant 0 : index
    %c0_73 = arith.constant 0 : index
    %c0_74 = arith.constant 0 : index
    %135 = vector.load %arg17[%c0_71, %c0_72, %c0_73, %c0_74] : memref<1x1x1x32xf32, #tpu.memory_space<vmem>>, vector<1x1x1x32xf32>
    %136 = vector.shape_cast %135 : vector<1x1x1x32xf32> to vector<1x32xf32>
    %cst_75 = arith.constant dense<0.000000e+00> : vector<16xf32>
    %137 = vector.multi_reduction <add>, %132, %cst_75 [1] : vector<16x32xf32> to vector<16xf32>
    %138 = vector.shape_cast %137 : vector<16xf32> to vector<16x1xf32>
    %cst_76 = arith.constant 3.200000e+01 : f32
    %139 = vector.broadcast %cst_76 : f32 to vector<16x1xf32>
    %140 = arith.divf %138, %139 : vector<16x1xf32>
    %141 = vector.broadcast %140 : vector<16x1xf32> to vector<16x32xf32>
    %142 = arith.subf %132, %141 : vector<16x32xf32>
    %143 = arith.mulf %142, %142 : vector<16x32xf32>
    %cst_77 = arith.constant dense<0.000000e+00> : vector<16xf32>
    %144 = vector.multi_reduction <add>, %143, %cst_77 [1] : vector<16x32xf32> to vector<16xf32>
    %145 = vector.shape_cast %144 : vector<16xf32> to vector<16x1xf32>
    %cst_78 = arith.constant 3.200000e+01 : f32
    %146 = vector.broadcast %cst_78 : f32 to vector<16x1xf32>
    %147 = arith.divf %145, %146 : vector<16x1xf32>
    %148 = vector.broadcast %140 : vector<16x1xf32> to vector<16x32xf32>
    %149 = arith.subf %132, %148 : vector<16x32xf32>
    %cst_79 = arith.constant 9.99999996E-13 : f32
    %150 = vector.broadcast %cst_79 : f32 to vector<16x1xf32>
    %151 = arith.addf %147, %150 : vector<16x1xf32>
    %152 = math.rsqrt %151 : vector<16x1xf32>
    %153 = vector.broadcast %152 : vector<16x1xf32> to vector<16x32xf32>
    %154 = arith.mulf %149, %153 : vector<16x32xf32>
    %155 = vector.broadcast %134 : vector<1x32xf32> to vector<16x32xf32>
    %156 = arith.mulf %154, %155 : vector<16x32xf32>
    %157 = vector.broadcast %136 : vector<1x32xf32> to vector<16x32xf32>
    %158 = arith.addf %156, %157 : vector<16x32xf32>
    %c0_80 = arith.constant 0 : index
    %c0_81 = arith.constant 0 : index
    %159 = vector.load %arg19[%c0_80, %c0_81] : memref<16x32xf32, #tpu.memory_space<vmem>>, vector<16x32xf32>
    tpu.vector_store %arg19[%c0_80, %c0_81], %158 {strides = array<i32>} : memref<16x32xf32, #tpu.memory_space<vmem>>, vector<16x32xf32>,
    %c1_i32 = arith.constant 1 : i32
    %160 = arith.cmpi eq, %arg1, %c1_i32 : i32
    %161 = arith.extui %160 : i1 to i32
    %c0_i32_82 = arith.constant 0 : i32
    %162 = arith.cmpi ne, %161, %c0_i32_82 : i32
    scf.if %162 {
      %163 = arith.truncf %158 : vector<16x32xf32> to vector<16x32xbf16>
      %c0_83 = arith.constant 0 : index
      %c0_84 = arith.constant 0 : index
      %c0_85 = arith.constant 0 : index
      %164 = vector.load %arg18[%c0_83, %c0_84, %c0_85] : memref<1x16x32xbf16, #tpu.memory_space<vmem>>, vector<1x16x32xbf16>
      %165 = vector.shape_cast %164 : vector<1x16x32xbf16> to vector<16x32xbf16>
      %166 = vector.shape_cast %163 : vector<16x32xbf16> to vector<1x16x32xbf16>
      tpu.vector_store %arg18[%c0_83, %c0_84, %c0_85], %166 {strides = array<i32>} : memref<1x16x32xbf16, #tpu.memory_space<vmem>>, vector<1x16x32xbf16>,
    } else {
    }
    return
  }
  func.func @transform_0(%arg0: i32, %arg1: i32) -> (i32, i32, i32) {
    %c0_i32 = arith.constant 0 : i32
    %c0_i32_0 = arith.constant 0 : i32
    %c0_i32_1 = arith.constant 0 : i32
    return %arg0, %c0_i32, %c0_i32_0 : i32, i32, i32
  }
  func.func @transform_1(%arg0: i32, %arg1: i32) -> (i32, i32, i32) {
    %c0_i32 = arith.constant 0 : i32
    %c0_i32_0 = arith.constant 0 : i32
    %c0_i32_1 = arith.constant 0 : i32
    %c0_i32_2 = arith.constant 0 : i32
    return %c0_i32, %c0_i32_0, %c0_i32_1 : i32, i32, i32
  }
  func.func @transform_2(%arg0: i32, %arg1: i32) -> (i32, i32, i32) {
    %c0_i32 = arith.constant 0 : i32
    %c0_i32_0 = arith.constant 0 : i32
    %c0_i32_1 = arith.constant 0 : i32
    return %arg0, %c0_i32, %c0_i32_0 : i32, i32, i32
  }
  func.func @transform_3(%arg0: i32, %arg1: i32) -> (i32, i32, i32) {
    %c0_i32 = arith.constant 0 : i32
    %c0_i32_0 = arith.constant 0 : i32
    %c0_i32_1 = arith.constant 0 : i32
    return %arg0, %c0_i32, %c0_i32_0 : i32, i32, i32
  }
  func.func @transform_4(%arg0: i32, %arg1: i32) -> (i32, i32, i32, i32) {
    %c0_i32 = arith.constant 0 : i32
    %c0_i32_0 = arith.constant 0 : i32
    %c0_i32_1 = arith.constant 0 : i32
    return %arg0, %arg1, %c0_i32, %c0_i32_0 : i32, i32, i32, i32
  }
  func.func @transform_5(%arg0: i32, %arg1: i32) -> (i32, i32, i32, i32) {
    %c0_i32 = arith.constant 0 : i32
    %c0_i32_0 = arith.constant 0 : i32
    %c0_i32_1 = arith.constant 0 : i32
    return %arg0, %arg1, %c0_i32, %c0_i32_0 : i32, i32, i32, i32
  }
  func.func @transform_6(%arg0: i32, %arg1: i32) -> (i32, i32, i32, i32) {
    %c0_i32 = arith.constant 0 : i32
    %c0_i32_0 = arith.constant 0 : i32
    %c0_i32_1 = arith.constant 0 : i32
    return %arg0, %arg1, %c0_i32, %c0_i32_0 : i32, i32, i32, i32
  }
  func.func @transform_7(%arg0: i32, %arg1: i32) -> (i32, i32, i32, i32) {
    %c0_i32 = arith.constant 0 : i32
    %c0_i32_0 = arith.constant 0 : i32
    %c0_i32_1 = arith.constant 0 : i32
    return %arg0, %arg1, %c0_i32, %c0_i32_0 : i32, i32, i32, i32
  }
  func.func @transform_8(%arg0: i32, %arg1: i32) -> (i32, i32, i32, i32) {
    %c0_i32 = arith.constant 0 : i32
    %c0_i32_0 = arith.constant 0 : i32
    %c0_i32_1 = arith.constant 0 : i32
    return %arg0, %arg1, %c0_i32, %c0_i32_0 : i32, i32, i32, i32
  }
  func.func @transform_9(%arg0: i32, %arg1: i32) -> (i32, i32, i32, i32) {
    %c0_i32 = arith.constant 0 : i32
    %c0_i32_0 = arith.constant 0 : i32
    %c0_i32_1 = arith.constant 0 : i32
    return %arg0, %arg1, %c0_i32, %c0_i32_0 : i32, i32, i32, i32
  }
  func.func @transform_10(%arg0: i32, %arg1: i32) -> (i32, i32, i32, i32) {
    %c0_i32 = arith.constant 0 : i32
    %c0_i32_0 = arith.constant 0 : i32
    %c0_i32_1 = arith.constant 0 : i32
    return %arg0, %arg1, %c0_i32, %c0_i32_0 : i32, i32, i32, i32
  }
  func.func @transform_11(%arg0: i32, %arg1: i32) -> (i32, i32, i32, i32) {
    %c0_i32 = arith.constant 0 : i32
    %c0_i32_0 = arith.constant 0 : i32
    %c0_i32_1 = arith.constant 0 : i32
    return %arg0, %arg1, %c0_i32, %c0_i32_0 : i32, i32, i32, i32
  }
  func.func @transform_12(%arg0: i32, %arg1: i32) -> (i32, i32, i32, i32) {
    %c0_i32 = arith.constant 0 : i32
    %c0_i32_0 = arith.constant 0 : i32
    %c0_i32_1 = arith.constant 0 : i32
    return %arg0, %arg1, %c0_i32, %c0_i32_0 : i32, i32, i32, i32
  }
  func.func @transform_13(%arg0: i32, %arg1: i32) -> (i32, i32, i32, i32) {
    %c0_i32 = arith.constant 0 : i32
    %c0_i32_0 = arith.constant 0 : i32
    %c0_i32_1 = arith.constant 0 : i32
    return %arg0, %arg1, %c0_i32, %c0_i32_0 : i32, i32, i32, i32
  }
  func.func @transform_14(%arg0: i32, %arg1: i32) -> (i32, i32, i32, i32) {
    %c0_i32 = arith.constant 0 : i32
    %c0_i32_0 = arith.constant 0 : i32
    %c0_i32_1 = arith.constant 0 : i32
    return %arg0, %arg1, %c0_i32, %c0_i32_0 : i32, i32, i32, i32
  }
  func.func @transform_15(%arg0: i32, %arg1: i32) -> (i32, i32, i32, i32) {
    %c0_i32 = arith.constant 0 : i32
    %c0_i32_0 = arith.constant 0 : i32
    %c0_i32_1 = arith.constant 0 : i32
    return %arg0, %arg1, %c0_i32, %c0_i32_0 : i32, i32, i32, i32
  }
  func.func @transform_16(%arg0: i32, %arg1: i32) -> (i32, i32, i32) {
    %c0_i32 = arith.constant 0 : i32
    %c0_i32_0 = arith.constant 0 : i32
    %c0_i32_1 = arith.constant 0 : i32
    return %arg0, %c0_i32, %c0_i32_0 : i32, i32, i32
  }
}

</mosaic_0001>

<bundles_post_ra>
// kernel: bert_combined_forward.1
= control target key start
LH: loop header
LB: loop body
LE: loop exit
PB: predicated region body
PF: predicated region fallthrough
CT: control target
= control target key end

     0   :  { %s2587_s21 = smov 0   ;;  %s2589_s22 = smov 0   ;;  %s2906_s0 = inlined_call_operand.vmem [shape: bf16[2,16,32], index: 0, kind: input, shape index: {}]   ;;  %s2907_s1 = inlined_call_operand.vmem [shape: f32[2,1,8], index: 1, kind: input, shape index: {}]   ;;  %s2908_s2 = inlined_call_operand.vmem [shape: f32[2,1,32], index: 2, kind: input, shape index: {}]   ;;  %s2909_s3 = inlined_call_operand.vmem [shape: f32[2,1,32], index: 3, kind: input, shape index: {}]   ;;  %s2910_s4 = inlined_call_operand.vmem [shape: bf16[2,2,32,96], index: 4, kind: input, shape index: {}]   ;;  %s2911_s5 = inlined_call_operand.vmem [shape: f32[2,2,1,96], index: 5, kind: input, shape index: {}]   ;;  %s2912_s6 = inlined_call_operand.vmem [shape: bf16[2,2,32,32], index: 6, kind: input, shape index: {}]   ;;  %s2913_s7 = inlined_call_operand.vmem [shape: f32[2,2,1,32], index: 7, kind: input, shape index: {}]   ;;  %s2914_s8 = inlined_call_operand.vmem [shape: f32[2,2,1,32], index: 8, kind: input, shape index: {}]   ;;  %s2915_s9 = inlined_call_operand.vmem [shape: f32[2,2,1,32], index: 9, kind: input, shape index: {}]   ;;  %s2916_s10 = inlined_call_operand.vmem [shape: bf16[2,2,32,64], index: 10, kind: input, shape index: {}]   ;;  %s2917_s11 = inlined_call_operand.vmem [shape: f32[2,2,1,64], index: 11, kind: input, shape index: {}]   ;;  %s2918_s12 = inlined_call_operand.vmem [shape: bf16[2,2,64,32], index: 12, kind: input, shape index: {}]   ;;  %s2919_s13 = inlined_call_operand.vmem [shape: f32[2,2,1,32], index: 13, kind: input, shape index: {}]   ;;  %s2920_s14 = inlined_call_operand.vmem [shape: f32[2,2,1,32], index: 14, kind: input, shape index: {}]   ;;  %s2921_s15 = inlined_call_operand.vmem [shape: f32[2,2,1,32], index: 15, kind: input, shape index: {}]   ;;  %s2922_s16 = inlined_call_operand.vmem [shape: bf16[2,16,32], index: 16, kind: output, shape index: {}]  }
   0x1   :  { %2929 = sst [smem:[#allocation10_spill]] %s2906_s0  ;;  %s2591_s23 = smov 0  }
   0x2   :  { %2930 = sst [smem:[#allocation11_spill]] %s2907_s1  ;;  %s2593_s24 = smov 0  }
   0x3   :  { %2931 = sst [smem:[#allocation12_spill]] %s2908_s2  ;;  %s2595_s25 = smov 0  }
   0x4   :  { %2932 = sst [smem:[#allocation13_spill]] %s2909_s3 }
   0x5   :  { %2933 = sst [smem:[#allocation14_spill]] %s2910_s4 }
   0x6   :  { %2934 = sst [smem:[#allocation15_spill]] %s2912_s6 }
   0x7   :  { %2935 = sst [smem:[#allocation16_spill]] %s2914_s8 }
   0x8   :  { %2936 = sst [smem:[#allocation17_spill]] %s2915_s9 }
   0x9   :  { %2937 = sst [smem:[#allocation18_spill]] %s2916_s10 }
   0xa   :  { %2938 = sst [smem:[#allocation19_spill]] %s2917_s11 }
   0xb   :  { %2939 = sst [smem:[#allocation20_spill]] %s2918_s12 }
   0xc   :  { %2940 = sst [smem:[#allocation21_spill]] %s2921_s15 }
   0xd   :  { %2941 = sst [smem:[#allocation22_spill]] %s2922_s16 }
   0xe LB: > { %2942 = sst [smem:[#allocation3_spill]] %s2476_s21  ;;  %s35_s26 = sadd.s32 1, %s2484_s23  ;;  %s2492_s25 = sphi %s2595_s25, %s26_s25   ;;  %s2488_s24 = sphi %s2593_s24, %s2982_s24   ;;  %s2484_s23 = sphi %s2591_s23, %s2981_s23   ;;  %s2480_s22 = sphi %s2589_s22, %s2980_s22   ;;  %s2476_s21 = sphi %s2587_s21, %s2979_s21  }
   0xf   : > { %2943 = sst [smem:[#allocation4_spill]] %s2484_s23  ;;  %s38_s27 = sadd.s32 1, %s2488_s24 }
  0x10   : > { %2944 = sst [smem:[#allocation5_spill]] %s2488_s24  ;;  %p36_p0 = scmp.ge.s32.totalorder %s35_s26, 2 }
  0x11   : > { %2945 = sst [smem:[#allocation6_spill]] %s2492_s25  ;;  %p2168_p1 = scmp.ge.s32.totalorder %s2492_s25, 1 }
  0x12   : > { %p666_p2 = scmp.lt.s32.totalorder %s2492_s25, 5  ;;  %s2984_s26 = smov (%p36_p0, %s35_s26), 0 }
  0x13   : > { %2946 = sst [smem:[#allocation7_spill]] %s2984_s26  ;;  %s2986_s27 = smov (!%p36_p0, %s38_s27), %s2488_s24 }
  0x14   : > { %p667_p3 = pnand %p2168_p1, %p666_p2  ;;  %p40_p4 = scmp.ge.s32.totalorder %s2986_s27, 2 }
  0x16   : > { %s2988_s27 = smov (%p40_p4, %s2986_s27), 0  ;;  %670 = sbr.rel (%p667_p3) target bundleno = 3439 (0xd6f), region = 84 }
  0x17   : > { %2947 = sst [smem:[#allocation8_spill]] %s2988_s27 }
  0x1d   : > { %p814_p5 = scmp.lt.s32.totalorder %s2480_s22, 1  ;;  %p827_p6 = scmp.lt.s32.totalorder %s2476_s21, 1 }
  0x1e   : > { %s2949_s20 = sld [smem:[#allocation10_spill]]  ;;  %s2951_s4 = sld [smem:[#allocation14_spill]] }
  0x1f   : > { %s2990_s22 = smov (!%p814_p5, %s2480_s22), 1  ;;  %s2952_s6 = sld [smem:[#allocation15_spill]] }
  0x20   : > { %s828_s28 = scalar_select %p827_p6, %s2476_s21, 1 }
  0x21   : > { %s2235_s29 = sshll.u32 %s2990_s22, 3  ;;  %s2174_s1 = sshll.u32 %s2990_s22, 1 }
  0x22   : > { %s2171_s25 = sshll.u32 %s828_s28, 2  ;;  %s2636_s12 = sadd.s32 %s2174_s1, %s828_s28 }
  0x23   : > { %s831_s16 = sadd.s32 %s2235_s29, %s2171_s25  ;;  %s2956_s10 = sld [smem:[#allocation18_spill]] }
  0x24   : > { %s818_s27 = scalar_lea.vmem %s2949_s20, %s2235_s29  ;;  %s2173_s30 = sshll.u32 %s831_s16, 2 }
  0x25   : > { %s2645_s20 = scalar_lea.vmem %s2951_s4, %s2173_s30  ;;  %s2650_s23 = scalar_lea.vmem %s2952_s6, %s2173_s30 }
  0x26   : > { %2953 = sst [smem:[#allocation9_spill]] %s2650_s23  ;;  %s2185_s23 = sshll.u32 %s828_s28, 3 }
  0x27   : > { %s2186_s3 = sshll.u32 %s2990_s22, 4  ;;  %s902_s21 = scalar_lea.vmem %s2919_s13, %s2636_s12 }
  0x28   : > { %s893_s16 = sadd.s32 %s2186_s3, %s2185_s23  ;;  %s909_s0 = scalar_lea.vmem %s2920_s14, %s2636_s12 }
  0x29   : > { %s2667_s4 = scalar_lea.vmem %s2956_s10, %s2173_s30  ;;  %s2187_s18 = sshll.u32 %s893_s16, 2 }
  0x2a   : > { %s2958_s30 = sld [smem:[#allocation21_spill]]  ;;  %s2959_s1 = sld [smem:[#allocation20_spill]] }
  0x2b   : > { %s2960_s11 = sld [smem:[#allocation22_spill]]  ;;  %s2961_s23 = sld [smem:[#allocation3_spill]] }
  0x30   : > { %s916_s19 = scalar_lea.vmem %s2958_s30, %s2636_s12  ;;  %s2689_s25 = scalar_lea.vmem %s2959_s1, %s2187_s18 }
  0x31   : > { %s2694_s2 = scalar_lea.vmem %s2960_s11, %s2235_s29  ;;  %p2193_p7 = scmp.ne.s32.totalorder %s2961_s23, 0 }
  0x32   : > { %v2242_v0 = vld [vmem:[%s818_s27] sm:$0xff] (!%p2193_p7)   ;;  %vm933_vm0 = vcmask (!%p2193_p7), 261120   ;;  %s2962_s9 = sld [smem:[#allocation12_spill]] (!%p2193_p7)  ;;  %s2964_s27 = sld [smem:[#allocation13_spill]] (!%p2193_p7) }
  0x33   : > { %926 = sbr.rel (%p2193_p7) target bundleno = 371 (0x173), region = 88  ;;  %v2243_v1 = vunpack.c.l.bf16 (!%p2193_p7), %v2242_v0  ;;  %v2244_v2 = vunpack.c.h.bf16 (!%p2193_p7), %v2242_v0 }
  0x35   : > { %v934_v3 = vsel (!%p2193_p7), %vm933_vm0, %v2243_v1, 0.0  ;;  %v937_v4 = vsel (!%p2193_p7), %vm933_vm0, %v2244_v2, 0.0 }
  0x36   : > { %935 = vadd.xlane.f32.xlu0 (!%p2193_p7), %v934_v3 }
  0x38   : > { %s2963_s10 = scalar_lea.vmem (!%p2193_p7), %s2962_s9, %s2990_s22  ;;  %s2965_s29 = scalar_lea.vmem (!%p2193_p7), %s2964_s27, %s2990_s22 }
  0x39   : > { %v2194_v22 = vld [vmem:[%s2963_s10] ss:$0 sm:$0xff] (!%p2193_p7) }
  0x3a   : > { %938 = vadd.xlane.f32.xlu0 %v937_v4  ;;  %v2195_v24 = vld [vmem:[%s2965_s29] ss:$0 sm:$0xff] }
  0xc3   : > { %v936_v5 = vpop.xlane.xlu0 %935 }
  0xc4   : > { %v941_v6 = vmul.f32 0.03125, %v936_v5 }
  0xc6   : > { %v943_v7 = vsub.f32 %v2243_v1, %v941_v6 }
  0xc7   : > { %v939_v8 = vpop.xlane.xlu0 %938 }
  0xc8   : > { %v942_v9 = vmul.f32 0.03125, %v939_v8  ;;  %v945_v10 = vmul.f32 %v943_v7, %v943_v7 }
  0xca   : > { %v944_v11 = vsub.f32 %v2244_v2, %v942_v9  ;;  %v947_v12 = vsel %vm933_vm0, %v945_v10, 0.0 }
  0xcb   : > { %948 = vadd.xlane.f32.xlu1 %v947_v12 }
  0xcc   : > { %v946_v13 = vmul.f32 %v944_v11, %v944_v11 }
  0xce   : > { %v950_v14 = vsel %vm933_vm0, %v946_v13, 0.0 }
  0xcf   : > { %951 = vadd.xlane.f32.xlu1 %v950_v14 }
 0x158   : > { %v949_v15 = vpop.xlane.xlu1 %948 }
 0x159   : > { %v953_v16 = vmul.f32 0.03125, %v949_v15 }
 0x15b   : > { %v955_v17 = vadd.f32 1e-12, %v953_v16 }
 0x15c   : > { %v952_v18 = vpop.xlane.xlu1 %951 }
 0x15d   : > { %2407 = vrsqrt.f32 %v955_v17  ;;  %v954_v19 = vmul.f32 0.03125, %v952_v18 }
 0x15f   : > { %v956_v20 = vadd.f32 1e-12, %v954_v19 }
 0x161   : > { %2409 = vrsqrt.f32 %v956_v20 }
 0x167   : > { %v2408_v21 = vpop.eup %2407 }
 0x168   : > { %v959_v23 = vmul.f32 %v2408_v21, %v943_v7 }
 0x16a   : > { %v967_v25 = vmul.f32 %v2194_v22, %v959_v23 }
 0x16b   : > { %v2410_v26 = vpop.eup %2409 }
 0x16c   : > { %v975_v27 = vadd.f32 %v2195_v24, %v967_v25  ;;  %v960_v28 = vmul.f32 %v2410_v26, %v944_v11 }
 0x16e   : > { %977 = vst.msk [vmem:[#allocation2] sm:$0xff] %vm933_vm0, %v975_v27  ;;  %v968_v29 = vmul.f32 %v2194_v22, %v960_v28 }
 0x170   : > { %v976_v30 = vadd.f32 %v2195_v24, %v968_v29 }
 0x172   : > { %978 = vst.msk [vmem:[#allocation2 + $0x8] sm:$0xff] %vm933_vm0, %v976_v30 }
 0x173 PF: > { %v2416_v31 = vld [vmem:[%s2645_s20] sm:$0xff]   ;;  %v2494_v32 = vmov 0.0   ;;  %v2417_v33 = vld [vmem:[%s2645_s20 + $0x8] sm:$0xff]   ;;  %vm2495_vm1 = vmmov 0   ;;  %vm1005_vm2 = vcmask 261120   ;;  %s2966_s20 = scalar_lea.vmem %s2911_s5, %s2636_s12  ;;  %s2496_s3 = smov 96  }
 0x174   : > { %2275 = vmatprep.subr.bf16.mxu0 %v2494_v32  ;;  %2283 = vmatprep.subr.bf16.mxu1 %v2494_v32  ;;  %v2196_v37 = vld [vmem:[%s2966_s20] ss:$0 sm:$0xff]  ;;  %vm1072_vm3 = vcmask 130048   ;;  %s2967_s18 = sld [smem:[#allocation11_spill]]  ;;  %vm1171_vm4 = vcmask 64512   ;;  %s2497_s1 = smov 64  }
 0x175   : > { %2276 = vmatpush3.bf16.msra.mxu0 %v2416_v31  ;;  %2279 = vmatprep.mubr.msk.bf16.mxu0 %vm2495_vm1, %v2494_v32  ;;  %v2719_v34 = vld [vmem:[#allocation2] sm:$0xff]  ;;  %s2498_s28 = smov 80   ;;  %vm1201_vm5 = vcmask 1043456   ;;  %s2499_s23 = smov 112   ;;  %vm1768_vm6 = vcmask 523264  }
 0x176   : > { %2277 = vmatprep.subr.bf16.mxu0 %v2494_v32  ;;  %2285 = vmatprep.mubr.msk.bf16.mxu1 %vm2495_vm1, %v2494_v32  ;;  %s2500_s6 = smov 48   ;;  %s2968_s8 = sld [smem:[#allocation9_spill]] }
 0x177   : > { %s2501_s9 = smov 16   ;;  %s2969_s15 = scalar_lea.vmem %s2913_s7, %s2636_s12 }
 0x178   : > { %s2970_s22 = sld [smem:[#allocation16_spill]]  ;;  %s2974_s30 = sld [smem:[#allocation19_spill]] }
 0x179   : > { %v2721_v35 = vld [vmem:[#allocation2 + $0x8] sm:$0xff]  ;;  %2278 = vmatpush3.bf16.msra.mxu0 %v2417_v33  ;;  %s2977_s10 = sld [smem:[#allocation3_spill]] }
 0x17a   : > { %v981_v36 = vpack.c.bf16 %v2721_v35, %v2719_v34  ;;  %2289 = vmatprep.subr.bf16.mxu0 %v2494_v32  ;;  %v2758_v51 = vld [vmem:[%s2967_s18] ss:$0 sm:$0xff]  ;;  %v2764_v58 = vld [vmem:[%s2967_s18 + $0x1] ss:$0 sm:$0xff] }
 0x17c   : > { %2280 = vmatmul.mubr.msk.bf16.vlgmr.msra.gmra.mrb[0].mxu0 %vm1005_vm2, %v981_v36 }
 0x17d   : > { %2291 = vmatprep.mubr.msk.bf16.mxu0 %vm2495_vm1, %v2494_v32 }
 0x17e   : > { %s2971_s24 = scalar_lea.vmem %s2970_s22, %s2636_s12 }
 0x17f   : > { %p2230_p8 = scmp.ne.s32.totalorder %s2977_s10, 1 }
 0x180   : > { %vm1873_vm7 = vcmask (!%p2230_p8), 257024  }
 0x24f   : > { %v1043_v38 = vpop.f32.mrb[0].mxu0 }
 0x250   : > { %v1044_v39 = vadd.f32 %v2196_v37, %v1043_v38  ;;  %v2281_v40 = vpop.f32.mrb[1].mxu0 }
 0x251   : > { %v1046_v41 = vpop.f32.mrb[2].mxu0 }
 0x252   : > { %v2737_v42 = vpack.c.bf16 %v1044_v39, %v1044_v39  ;;  %v1047_v43 = vadd.f32 %v2196_v37, %v1046_v41  ;;  %v2282_v44 = vpop.f32.mrb[3].mxu0 }
 0x254   : > { %1070 = vrot.lane.b32.xlu0 %v2737_v42, %s2496_s3  ;;  %v2740_v45 = vpack.c.bf16 %v1047_v43, %v1047_v43 }
 0x258   : > { %1119 = vrot.lane.b32.xlu0 %v2740_v45, %s2496_s3  ;;  %s2972_s3 = sld [smem:[#allocation17_spill]] }
 0x25e   : > { %s2973_s17 = scalar_lea.vmem %s2972_s3, %s2636_s12 }
 0x2c6   : > { %v1071_v46 = vpop.permute.xlu0 %1070 }
 0x2c7   : > { %v1077_v47 = vsel %vm1072_vm3, %v1071_v46, 0 }
 0x2c8   : > { %2284 = vmatpush3.bf16.xpose.msra.mxu1 %v1077_v47 }
 0x2c9   : > { %2295 = vmatprep.subr.bf16.mxu1 %v2494_v32 }
 0x2ca   : > { %v1120_v48 = vpop.permute.xlu0 %1119 }
 0x2cb   : > { %v1125_v49 = vsel %vm1072_vm3, %v1120_v48, 0 }
 0x2cc   : > { %2290 = vmatpush3.bf16.xpose.msra.mxu0 %v1125_v49 }
 0x2cd   : > { %2301 = vmatprep.subr.bf16.mxu0 %v2494_v32 }
 0x2cf   : > { %2286 = vmatmul.mubr.msk.bf16.vlgmr.msra.gmra.mrb[0].mxu1 %vm1072_vm3, %v2737_v42 }
 0x2d0   : > { %2297 = vmatprep.mubr.msk.bf16.mxu1 %vm2495_vm1, %v2494_v32 }
 0x2d3   : > { %2292 = vmatmul.mubr.msk.bf16.vlgmr.msra.gmra.mrb[4].mxu0 %vm1072_vm3, %v2740_v45 }
 0x2d4   : > { %2303 = vmatprep.mubr.msk.bf16.mxu0 %vm2495_vm1, %v2494_v32 }
 0x3a2   : > { %v1113_v50 = vpop.f32.mrb[0].mxu1 }
 0x3a3   : > { %v1167_v52 = vmul.f32 0.25, %v1113_v50  ;;  %v2287_v53 = vpop.f32.mrb[1].mxu1 }
 0x3a4   : > { %v1116_v54 = vpop.f32.mrb[2].mxu1 }
 0x3a5   : > { %v2288_v55 = vpop.f32.mrb[3].mxu1  ;;  %v1169_v56 = vadd.f32 %v2758_v51, %v1167_v52 }
 0x3a6   : > { %v1161_v57 = vpop.f32.mrb[4].mxu0 }
 0x3a7   : > { %v1168_v59 = vmul.f32 0.25, %v1161_v57  ;;  %v2293_v60 = vpop.f32.mrb[5].mxu0  ;;  %v1172_v61 = vsel %vm1171_vm4, %v1169_v56, -inf }
 0x3a8   : > { %1173 = vmax.xlane.f32.xlu1 %v1172_v61  ;;  %v1164_v62 = vpop.f32.mrb[6].mxu0 }
 0x3a9   : > { %v2294_v63 = vpop.f32.mrb[7].mxu0  ;;  %v1170_v0 = vadd.f32 %v2764_v58, %v1168_v59 }
 0x3ab   : > { %v1175_v1 = vsel %vm1171_vm4, %v1170_v0, -inf }
 0x3ac   : > { %1176 = vmax.xlane.f32.xlu1 %v1175_v1 }
 0x3bd   : > { %1196 = vrot.lane.b32.xlu1 %v2737_v42, %s2497_s1 }
 0x3c1   : > { %1245 = vrot.lane.b32.xlu1 %v2740_v45, %s2497_s1  ;;  %s2975_s1 = scalar_lea.vmem %s2974_s30, %s2636_s12 }
 0x3c5   : > { %1295 = vrot.lane.b32.xlu1 %v2737_v42, %s2498_s28 }
 0x435   : > { %v1174_v2 = vpop.xlane.xlu1 %1173 }
 0x436   : > { %v1178_v3 = vsub.f32 %v1169_v56, %v1174_v2 }
 0x438   : > { %v1180_v4 = vmul.f32 1.442695, %v1178_v3 }
 0x439   : > { %v1177_v5 = vpop.xlane.xlu1 %1176 }
 0x43a   : > { %2426 = vpow2.f32 %v1180_v4  ;;  %v1179_v6 = vsub.f32 %v1170_v0, %v1177_v5 }
 0x43c   : > { %v1182_v7 = vmul.f32 1.442695, %v1179_v6 }
 0x43d   : > { %v1197_v8 = vpop.permute.xlu1 %1196 }
 0x43e   : > { %2428 = vpow2.f32 %v1182_v7  ;;  %v1203_v9 = vsel %vm1201_vm5, %v1197_v8, 0 }
 0x43f   : > { %2296 = vmatpush3.bf16.msra.mxu1 %v1203_v9 }
 0x440   : > { %2307 = vmatprep.subr.bf16.mxu1 %v2494_v32 }
 0x441   : > { %v1246_v10 = vpop.permute.xlu1 %1245 }
 0x442   : > { %v1251_v11 = vsel %vm1201_vm5, %v1246_v10, 0 }
 0x443   : > { %2302 = vmatpush3.bf16.msra.mxu0 %v1251_v11 }
 0x444   : > { %v2427_v12 = vpop.eup %2426  ;;  %2313 = vmatprep.subr.bf16.mxu0 %v2494_v32 }
 0x445   : > { %v1184_v13 = vsel %vm1171_vm4, %v2427_v12, 0.0  ;;  %v1296_v16 = vpop.permute.xlu1 %1295 }
 0x446   : > { %1185 = vadd.xlane.f32.xlu0 %v1184_v13  ;;  %v1301_v23 = vsel %vm1072_vm3, %v1296_v16, 0  ;;  %v2418_v13 = vld [vmem:[%s2968_s8] sm:$0xff]  }
 0x448   : > { %v2429_v14 = vpop.eup %2428 }
 0x449   : > { %v1187_v15 = vsel %vm1171_vm4, %v2429_v14, 0.0 }
 0x44a   : > { %1188 = vadd.xlane.f32.xlu1 %v1187_v15 }
 0x45b   : > { %1345 = vrot.lane.b32.xlu1 %v2740_v45, %s2498_s28 }
 0x45c   : > { %1293 = vrot.lane.b32.xlu0 %v2737_v42, %s2499_s23 }
 0x45f   : > { %1343 = vrot.lane.b32.xlu1 %v2740_v45, %s2499_s23 }
 0x4d3   : > { %v1186_v17 = vpop.xlane.xlu0 %1185 }
 0x4d4   : > { %2430 = vrcp.f32 %v1186_v17 }
 0x4d7   : > { %v1189_v18 = vpop.xlane.xlu1 %1188  ;;  %v1294_v28 = vpop.permute.xlu0 %1293 }
 0x4d8   : > { %2432 = vrcp.f32 %v1189_v18 }
 0x4db   : > { %v1346_v25 = vpop.permute.xlu1 %1345 }
 0x4dc   : > { %v1351_v27 = vsel %vm1072_vm3, %v1346_v25, 0 }
 0x4de   : > { %v2431_v19 = vpop.eup %2430 }
 0x4df   : > { %v1192_v20 = vmul.f32 %v2431_v19, %v2427_v12  ;;  %v1344_v29 = vpop.permute.xlu1 %1343 }
 0x4e1   : > { %v1194_v21 = vpack.c.bf16 %v1192_v20, %v1192_v20 }
 0x4e2   : > { %v2433_v22 = vpop.eup %2432 }
 0x4e3   : > { %v1193_v24 = vmul.f32 %v2433_v22, %v2429_v14  ;;  %2298 = vmatmul.mubr.msk.bf16.vlgmr.msra.gmra.mrb[4].mxu1 %vm1171_vm4, %v1194_v21  ;;  %v2419_v14 = vld [vmem:[%s2968_s8 + $0x8] sm:$0xff]  }
 0x4e4   : > { %2308 = vmatpush3.bf16.xpose.msra.mxu1 %v1301_v23  ;;  %2309 = vmatprep.mubr.msk.bf16.mxu1 %vm2495_vm1, %v2494_v32 }
 0x4e5   : > { %v1195_v26 = vpack.c.bf16 %v1193_v24, %v1193_v24  ;;  %2319 = vmatprep.subr.bf16.mxu1 %v2494_v32 }
 0x4e7   : > { %2304 = vmatmul.mubr.msk.bf16.vlgmr.msra.gmra.mrb[8].mxu0 %vm1171_vm4, %v1195_v26 }
 0x4e8   : > { %2314 = vmatpush3.bf16.xpose.msra.mxu0 %v1351_v27  ;;  %2315 = vmatprep.mubr.msk.bf16.mxu0 %vm2495_vm1, %v2494_v32 }
 0x4e9   : > { %2325 = vmatprep.subr.bf16.mxu0 %v2494_v32 }
 0x4eb   : > { %2310 = vmatmul.mubr.msk.bf16.vlgmr.msra.gmra.mrb[8].mxu1 %vm1072_vm3, %v1294_v28 }
 0x4ec   : > { %2321 = vmatprep.mubr.msk.bf16.mxu1 %vm2495_vm1, %v2494_v32 }
 0x4ef   : > { %2316 = vmatmul.mubr.msk.bf16.vlgmr.msra.gmra.mrb[12].mxu0 %vm1072_vm3, %v1344_v29 }
 0x4f0   : > { %2327 = vmatprep.mubr.msk.bf16.mxu0 %vm2495_vm1, %v2494_v32 }
 0x5b6   : > { %v2797_v30 = vpop.f32.mrb[4].mxu1 }
 0x5b7   : > { %v2299_v31 = vpop.f32.mrb[5].mxu1 }
 0x5b8   : > { %v1242_v33 = vpop.f32.mrb[6].mxu1  ;;  %v2212_v31 = vld [vmem:[%s2969_s15] ss:$0 sm:$0xff] }
 0x5b9   : > { %v2300_v36 = vpop.f32.mrb[7].mxu1 }
 0x5ba   : > { %v2799_v37 = vpop.f32.mrb[8].mxu0 }
 0x5bb   : > { %v2305_v38 = vpop.f32.mrb[9].mxu0 }
 0x5bc   : > { %v1290_v39 = vpop.f32.mrb[10].mxu0 }
 0x5bd   : > { %v2306_v40 = vpop.f32.mrb[11].mxu0 }
 0x5be   : > { %v1337_v41 = vpop.f32.mrb[8].mxu1 }
 0x5bf   : > { %v1393_v43 = vmul.f32 0.25, %v1337_v41  ;;  %v2311_v44 = vpop.f32.mrb[9].mxu1 }
 0x5c0   : > { %v1340_v46 = vpop.f32.mrb[10].mxu1 }
 0x5c1   : > { %v2312_v47 = vpop.f32.mrb[11].mxu1  ;;  %v1395_v48 = vadd.f32 %v2758_v51, %v1393_v43 }
 0x5c2   : > { %v1387_v49 = vpop.f32.mrb[12].mxu0 }
 0x5c3   : > { %v1394_v50 = vmul.f32 0.25, %v1387_v49  ;;  %v2317_v52 = vpop.f32.mrb[13].mxu0  ;;  %v1397_v53 = vsel %vm1171_vm4, %v1395_v48, -inf }
 0x5c4   : > { %1398 = vmax.xlane.f32.xlu1 %v1397_v53  ;;  %v1390_v54 = vpop.f32.mrb[14].mxu0 }
 0x5c5   : > { %v2318_v55 = vpop.f32.mrb[15].mxu0  ;;  %v1396_v56 = vadd.f32 %v2764_v58, %v1394_v50 }
 0x5c7   : > { %v1400_v57 = vsel %vm1171_vm4, %v1396_v56, -inf }
 0x5c8   : > { %1401 = vmax.xlane.f32.xlu0 %v1400_v57 }
 0x5de   : > { %1469 = vrot.lane.b32.xlu0 %v2740_v45, %s2500_s6 }
 0x651   : > { %v1399_v59 = vpop.xlane.xlu1 %1398 }
 0x652   : > { %v1403_v60 = vsub.f32 %v1395_v48, %v1399_v59 }
 0x654   : > { %v1405_v61 = vmul.f32 1.442695, %v1403_v60 }
 0x655   : > { %v1402_v51 = vpop.xlane.xlu0 %1401 }
 0x656   : > { %2434 = vpow2.f32 %v1405_v61  ;;  %v1404_v62 = vsub.f32 %v1396_v56, %v1402_v51  ;;  %v2421_v56 = vld [vmem:[%s2667_s4 + $0x8] sm:$0xff]  }
 0x658   : > { %v1407_v63 = vmul.f32 1.442695, %v1404_v62 }
 0x659   : > { %v1470_v0 = vpop.permute.xlu0 %1469 }
 0x65a   : > { %2436 = vpow2.f32 %v1407_v63  ;;  %v1475_v1 = vsel %vm1201_vm5, %v1470_v0, 0  ;;  %v2216_v0 = vld [vmem:[%s2971_s24] ss:$0 sm:$0xff] }
 0x65b   : > { %2326 = vmatpush3.bf16.msra.mxu0 %v1475_v1 }
 0x65c   : > { %2339 = vmatprep.subr.bf16.mxu0 %v2494_v32 }
 0x660   : > { %v2435_v58 = vpop.eup %2434 }
 0x661   : > { %v1409_v2 = vsel %vm1171_vm4, %v2435_v58, 0.0 }
 0x662   : > { %1410 = vadd.xlane.f32.xlu1 %v1409_v2 }
 0x664   : > { %v2437_v3 = vpop.eup %2436 }
 0x665   : > { %v1412_v45 = vsel %vm1171_vm4, %v2437_v3, 0.0 }
 0x666   : > { %1413 = vadd.xlane.f32.xlu1 %v1412_v45  ;;  %v2217_v45 = vld [vmem:[%s2973_s17] ss:$0 sm:$0xff] }
 0x677   : > { %1421 = vrot.lane.b32.xlu1 %v2737_v42, %s2500_s6 }
 0x6ef   : > { %v1411_v4 = vpop.xlane.xlu1 %1410 }
 0x6f0   : > { %2438 = vrcp.f32 %v1411_v4 }
 0x6f3   : > { %v1414_v5 = vpop.xlane.xlu1 %1413 }
 0x6f4   : > { %2440 = vrcp.f32 %v1414_v5 }
 0x6f7   : > { %v1422_v6 = vpop.permute.xlu1 %1421 }
 0x6f8   : > { %v1427_v7 = vsel %vm1201_vm5, %v1422_v6, 0 }
 0x6f9   : > { %2320 = vmatpush3.bf16.msra.mxu1 %v1427_v7 }
 0x6fa   : > { %v2439_v8 = vpop.eup %2438  ;;  %2331 = vmatprep.subr.bf16.mxu1 %v2494_v32 }
 0x6fb   : > { %v1417_v9 = vmul.f32 %v2439_v8, %v2435_v58  ;;  %v2422_v8 = vld [vmem:[%s2689_s25] sm:$0xff]  }
 0x6fd   : > { %v1419_v10 = vpack.c.bf16 %v1417_v9, %v1417_v9  ;;  %v2423_v9 = vld [vmem:[%s2689_s25 + $0x8] sm:$0xff]  }
 0x6fe   : > { %v2441_v11 = vpop.eup %2440 }
 0x6ff   : > { %v1418_v12 = vmul.f32 %v2441_v11, %v2437_v3  ;;  %2322 = vmatmul.mubr.msk.bf16.vlgmr.msra.gmra.mrb[12].mxu1 %vm1171_vm4, %v1419_v10  ;;  %v2424_v10 = vld [vmem:[%s2689_s25 + $0x10] sm:$0xff]   ;;  %v2425_v11 = vld [vmem:[%s2689_s25 + $0x18] sm:$0xff]  }
 0x700   : > { %2335 = vmatprep.mubr.msk.bf16.mxu1 %vm2495_vm1, %v2494_v32  ;;  %2332 = vmatpush3.bf16.msra.mxu1 %v2418_v13 }
 0x701   : > { %v1420_v42 = vpack.c.bf16 %v1418_v12, %v1418_v12  ;;  %2333 = vmatprep.subr.bf16.mxu1 %v2494_v32  ;;  %v2218_v12 = vld [vmem:[%s2975_s1] ss:$0 sm:$0xff] }
 0x703   : > { %2328 = vmatmul.mubr.msk.bf16.vlgmr.msra.gmra.mrb[16].mxu0 %vm1171_vm4, %v1420_v42 }
 0x704   : > { %2343 = vmatprep.mubr.msk.bf16.mxu0 %vm2495_vm1, %v2494_v32  ;;  %2334 = vmatpush3.bf16.msra.mxu1 %v2419_v14 }
 0x705   : > { %2347 = vmatprep.subr.bf16.mxu1 %v2494_v32 }
 0x7d2   : > { %v1463_v15 = vpop.f32.mrb[12].mxu1 }
 0x7d3   : > { %v2323_v16 = vpop.f32.mrb[13].mxu1 }
 0x7d4   : > { %v1466_v17 = vpop.f32.mrb[14].mxu1 }
 0x7d5   : > { %v2324_v18 = vpop.f32.mrb[15].mxu1 }
 0x7d6   : > { %v1511_v19 = vpop.f32.mrb[16].mxu0 }
 0x7d7   : > { %v2411_v20 = vpack.i.bf16 %v1511_v19, %v1463_v15  ;;  %v2329_v21 = vpop.f32.mrb[17].mxu0 }
 0x7d8   : > { %v1514_v22 = vpop.f32.mrb[18].mxu0 }
 0x7d9   : > { %2412 = vrot.lane.b32.xlu1 %v2411_v20, %s2501_s9  ;;  %v2330_v23 = vpop.f32.mrb[19].mxu0 }
 0x84b   : > { %v2413_v24 = vpop.permute.xlu1 %2412 }
 0x84c   : > { %v2415_v25 = vunpack.i.h.bf16 %v2413_v24  ;;  %v2414_v26 = vunpack.i.l.bf16 %v2413_v24 }
 0x84e   : > { %v1526_v27 = vsel %vm1072_vm3, %v2799_v37, %v2415_v25  ;;  %v1525_v28 = vsel %vm1072_vm3, %v2797_v30, %v2414_v26 }
 0x84f   : > { %v1527_v29 = vpack.c.bf16 %v1526_v27, %v1525_v28 }
 0x851   : > { %2336 = vmatmul.mubr.msk.bf16.vlgmr.msra.gmra.mrb[16].mxu1 %vm1005_vm2, %v1527_v29 }
 0x852   : > { %2355 = vmatprep.mubr.msk.bf16.mxu1 %vm2495_vm1, %v2494_v32  ;;  %2348 = vmatpush3.bf16.msra.mxu1 %v2422_v8 }
 0x853   : > { %2349 = vmatprep.subr.bf16.mxu1 %v2494_v32 }
 0x856   : > { %2350 = vmatpush3.bf16.msra.mxu1 %v2423_v9 }
 0x857   : > { %2351 = vmatprep.subr.bf16.mxu1 %v2494_v32 }
 0x85a   : > { %2352 = vmatpush3.bf16.msra.mxu1 %v2424_v10 }
 0x85b   : > { %2353 = vmatprep.subr.bf16.mxu1 %v2494_v32 }
 0x85e   : > { %2354 = vmatpush3.bf16.msra.mxu1 %v2425_v11 }
 0x924   : > { %v1588_v33 = vpop.f32.mrb[16].mxu1 }
 0x925   : > { %v1589_v36 = vadd.f32 %v2212_v31, %v1588_v33  ;;  %v2337_v38 = vpop.f32.mrb[17].mxu1 }
 0x926   : > { %v1591_v39 = vpop.f32.mrb[18].mxu1 }
 0x927   : > { %v1592_v40 = vadd.f32 %v2212_v31, %v1591_v39  ;;  %v2338_v37 = vpop.f32.mrb[19].mxu1  ;;  %v1595_v41 = vadd.f32 %v1589_v36, %v2719_v34 }
 0x928   : > { %v2222_v37 = vld [vmem:[%s902_s21] ss:$0 sm:$0xff] }
 0x929   : > { %v1599_v30 = vsel %vm1005_vm2, %v1595_v41, 0.0  ;;  %v1596_v43 = vadd.f32 %v1592_v40, %v2721_v35  ;;  %v2420_v35 = vld [vmem:[%s2667_s4] sm:$0xff]  }
 0x92a   : > { %1600 = vadd.xlane.f32.xlu1 %v1599_v30  ;;  %2340 = vmatpush3.bf16.msra.mxu0 %v2420_v35 }
 0x92b   : > { %v1602_v44 = vsel %vm1005_vm2, %v1596_v43, 0.0  ;;  %2341 = vmatprep.subr.bf16.mxu0 %v2494_v32 }
 0x92c   : > { %1603 = vadd.xlane.f32.xlu0 %v1602_v44 }
 0x92e   : > { %2342 = vmatpush3.bf16.msra.mxu0 %v2421_v56 }
 0x9b7   : > { %v1601_v46 = vpop.xlane.xlu1 %1600 }
 0x9b8   : > { %v1606_v47 = vmul.f32 0.03125, %v1601_v46 }
 0x9b9   : > { %v1604_v48 = vpop.xlane.xlu0 %1603 }
 0x9ba   : > { %v1608_v49 = vsub.f32 %v1595_v41, %v1606_v47  ;;  %v1607_v50 = vmul.f32 0.03125, %v1604_v48 }
 0x9bc   : > { %v1609_v52 = vsub.f32 %v1596_v43, %v1607_v50  ;;  %v1610_v53 = vmul.f32 %v1608_v49, %v1608_v49 }
 0x9be   : > { %v1612_v54 = vsel %vm1005_vm2, %v1610_v53, 0.0  ;;  %v1611_v34 = vmul.f32 %v1609_v52, %v1609_v52 }
 0x9bf   : > { %1613 = vadd.xlane.f32.xlu0 %v1612_v54 }
 0x9c0   : > { %v1615_v55 = vsel %vm1005_vm2, %v1611_v34, 0.0 }
 0x9c1   : > { %1616 = vadd.xlane.f32.xlu1 %v1615_v55 }
 0xa4c   : > { %v1614_v57 = vpop.xlane.xlu0 %1613 }
 0xa4d   : > { %v1618_v59 = vmul.f32 0.03125, %v1614_v57 }
 0xa4e   : > { %v1617_v60 = vpop.xlane.xlu1 %1616 }
 0xa4f   : > { %v1620_v61 = vadd.f32 1e-12, %v1618_v59  ;;  %v1619_v51 = vmul.f32 0.03125, %v1617_v60 }
 0xa51   : > { %2442 = vrsqrt.f32 %v1620_v61  ;;  %v1621_v62 = vadd.f32 1e-12, %v1619_v51 }
 0xa53   : > { %2444 = vrsqrt.f32 %v1621_v62 }
 0xa5b   : > { %v2443_v63 = vpop.eup %2442 }
 0xa5c   : > { %v1624_v1 = vmul.f32 %v2443_v63, %v1608_v49 }
 0xa5d   : > { %v2445_v58 = vpop.eup %2444 }
 0xa5e   : > { %v1632_v2 = vmul.f32 %v2216_v0, %v1624_v1  ;;  %v1625_v3 = vmul.f32 %v2445_v58, %v1609_v52 }
 0xa60   : > { %v1633_v4 = vmul.f32 %v2216_v0, %v1625_v3  ;;  %v1640_v5 = vadd.f32 %v2217_v45, %v1632_v2  ;;  %v2228_v3 = vld [vmem:[%s909_s0] ss:$0 sm:$0xff] }
 0xa62   : > { %v1641_v6 = vadd.f32 %v2217_v45, %v1633_v4 }
 0xa64   : > { %v1642_v7 = vpack.c.bf16 %v1641_v6, %v1640_v5 }
 0xa66   : > { %2344 = vmatmul.mubr.msk.bf16.vlgmr.msra.gmra.mrb[20].mxu0 %vm1005_vm2, %v1642_v7 }
 0xb39   : > { %v1703_v42 = vpop.f32.mrb[20].mxu0 }
 0xb3a   : > { %v1704_v13 = vadd.f32 %v2218_v12, %v1703_v42  ;;  %v2345_v14 = vpop.f32.mrb[21].mxu0 }
 0xb3b   : > { %v1706_v15 = vpop.f32.mrb[22].mxu0 }
 0xb3c   : > { %v1712_v16 = vmul.f32 0.044715, %v1704_v13  ;;  %v1707_v17 = vadd.f32 %v2218_v12, %v1706_v15  ;;  %v2346_v18 = vpop.f32.mrb[23].mxu0  ;;  %v1710_v31 = vmul.f32 0.5, %v1704_v13 }
 0xb3e   : > { %v1714_v19 = vmul.f32 %v1712_v16, %v1704_v13  ;;  %v1713_v20 = vmul.f32 0.044715, %v1707_v17  ;;  %v1711_v33 = vmul.f32 0.5, %v1707_v17 }
 0xb40   : > { %v1716_v21 = vmul.f32 %v1714_v19, %v1704_v13  ;;  %v1715_v22 = vmul.f32 %v1713_v20, %v1707_v17 }
 0xb42   : > { %v1718_v23 = vadd.f32 %v1716_v21, %v1704_v13  ;;  %v1717_v24 = vmul.f32 %v1715_v22, %v1707_v17 }
 0xb44   : > { %v1720_v32 = vmul.f32 0.7978846, %v1718_v23  ;;  %v1719_v25 = vadd.f32 %v1717_v24, %v1707_v17 }
 0xb46   : > { %2446 = vtanh.f32 %v1720_v32  ;;  %v1721_v26 = vmul.f32 0.7978846, %v1719_v25 }
 0xb48   : > { %2448 = vtanh.f32 %v1721_v26 }
 0xb50   : > { %v2447_v27 = vpop.eup %2446 }
 0xb51   : > { %v1724_v28 = vadd.f32 1.0, %v2447_v27 }
 0xb52   : > { %v2449_v29 = vpop.eup %2448 }
 0xb53   : > { %v1725_v36 = vadd.f32 1.0, %v2449_v29  ;;  %v1726_v38 = vmul.f32 %v1724_v28, %v1710_v31 }
 0xb55   : > { %v1727_v39 = vmul.f32 %v1725_v36, %v1711_v33 }
 0xb57   : > { %v1728_v40 = vpack.c.bf16 %v1727_v39, %v1726_v38 }
 0xb59   : > { %2356 = vmatmul.mubr.msk.bf16.vlgmr.msra.gmra.mrb[20].mxu1 %vm1768_vm6, %v1728_v40 }
 0xc2c   : > { %v1806_v41 = vpop.f32.mrb[20].mxu1 }
 0xc2d   : > { %v1807_v30 = vadd.f32 %v2222_v37, %v1806_v41  ;;  %v2357_v43 = vpop.f32.mrb[21].mxu1 }
 0xc2e   : > { %v1809_v44 = vpop.f32.mrb[22].mxu1 }
 0xc2f   : > { %v1810_v46 = vadd.f32 %v2222_v37, %v1809_v44  ;;  %v2358_v47 = vpop.f32.mrb[23].mxu1  ;;  %v1813_v48 = vadd.f32 %v1807_v30, %v1640_v5  ;;  %v2229_v5 = vld [vmem:[%s916_s19] ss:$0 sm:$0xff] }
 0xc31   : > { %v1817_v49 = vsel %vm1005_vm2, %v1813_v48, 0.0  ;;  %v1814_v50 = vadd.f32 %v1810_v46, %v1641_v6 }
 0xc32   : > { %1818 = vadd.xlane.f32.xlu0 %v1817_v49 }
 0xc33   : > { %v1820_v52 = vsel %vm1005_vm2, %v1814_v50, 0.0 }
 0xc34   : > { %1821 = vadd.xlane.f32.xlu1 %v1820_v52 }
 0xcbf   : > { %v1819_v53 = vpop.xlane.xlu0 %1818 }
 0xcc0   : > { %v1823_v54 = vmul.f32 0.03125, %v1819_v53 }
 0xcc1   : > { %v1822_v34 = vpop.xlane.xlu1 %1821 }
 0xcc2   : > { %v1825_v55 = vsub.f32 %v1813_v48, %v1823_v54  ;;  %v1824_v35 = vmul.f32 0.03125, %v1822_v34 }
 0xcc4   : > { %v1826_v56 = vsub.f32 %v1814_v50, %v1824_v35  ;;  %v1827_v57 = vmul.f32 %v1825_v55, %v1825_v55 }
 0xcc6   : > { %v1829_v59 = vsel %vm1005_vm2, %v1827_v57, 0.0  ;;  %v1828_v60 = vmul.f32 %v1826_v56, %v1826_v56 }
 0xcc7   : > { %1830 = vadd.xlane.f32.xlu0 %v1829_v59 }
 0xcc8   : > { %v1832_v61 = vsel %vm1005_vm2, %v1828_v60, 0.0 }
 0xcc9   : > { %1833 = vadd.xlane.f32.xlu1 %v1832_v61 }
 0xd54   : > { %v1831_v51 = vpop.xlane.xlu0 %1830 }
 0xd55   : > { %v1835_v62 = vmul.f32 0.03125, %v1831_v51 }
 0xd56   : > { %v1834_v63 = vpop.xlane.xlu1 %1833 }
 0xd57   : > { %v1837_v0 = vadd.f32 1e-12, %v1835_v62  ;;  %v1836_v1 = vmul.f32 0.03125, %v1834_v63 }
 0xd59   : > { %2450 = vrsqrt.f32 %v1837_v0  ;;  %v1838_v58 = vadd.f32 1e-12, %v1836_v1 }
 0xd5b   : > { %2452 = vrsqrt.f32 %v1838_v58 }
 0xd63   : > { %v2451_v2 = vpop.eup %2450 }
 0xd64   : > { %v1841_v45 = vmul.f32 %v2451_v2, %v1825_v55 }
 0xd65   : > { %v2453_v4 = vpop.eup %2452 }
 0xd66   : > { %v1849_v6 = vmul.f32 %v2228_v3, %v1841_v45  ;;  %v1842_v7 = vmul.f32 %v2453_v4, %v1826_v56  ;;  %1864 = sbr.rel (%p2230_p8) target bundleno = 3439 (0xd6f), region = 92 }
 0xd68   : > { %v1857_v8 = vadd.f32 %v2229_v5, %v1849_v6  ;;  %v1850_v9 = vmul.f32 %v2228_v3, %v1842_v7 }
 0xd6a   : > { %1859 = vst.msk [vmem:[#allocation2] sm:$0xff] %vm1005_vm2, %v1857_v8  ;;  %v1858_v10 = vadd.f32 %v2229_v5, %v1850_v9  ;;  %v2239_v11 = vpack.c.bf16 (!%p2230_p8), %v1857_v8, %v1857_v8 }
 0xd6c   : > { %1860 = vst.msk [vmem:[#allocation2 + $0x8] sm:$0xff] %vm1005_vm2, %v1858_v10  ;;  %v2240_v12 = vpack.c.bf16 (!%p2230_p8), %v1858_v10, %v1858_v10 }
 0xd6d   : > { %1874 = vst.msk [vmem:[%s2694_s2] sm:$0xf] %vm1873_vm7, %v2239_v11 }
 0xd6e   : > { %1875 = vst.msk [vmem:[%s2694_s2 + $0x4] sm:$0xf] %vm1873_vm7, %v2240_v12 }
 0xd6f PF: > { %s2978_s12 = sld [smem:[#allocation6_spill]]  ;;  %s2979_s21 = sld [smem:[#allocation4_spill]] }
 0xd70   : > { %s2980_s22 = sld [smem:[#allocation5_spill]]  ;;  %s2981_s23 = sld [smem:[#allocation7_spill]] }
 0xd71   : > { %s2982_s24 = sld [smem:[#allocation8_spill]] }
 0xd75   : > { %s26_s25 = sadd.s32 1, %s2978_s12  }
 0xd76   : > { %p23_p9 = scmp.ge.s32.totalorder %s26_s25, 6  }
 0xd78   :  { %25 = sbr.rel (!%p23_p9) target bundleno = 14 (0xe), region = 164 }

</bundles_post_ra>
